<compile_context>
chip_gen: v7x
topology: tpu7x:2x2x1
jax: 0.10.0
libtpu: 0.0.40
codegen_flags: <defaults>
</compile_context>

<pallas_src>
import jax
import jax.numpy as jnp
from jax import lax
from jax.experimental import pallas as pl
from jax.experimental.pallas import tpu as pltpu

NEG_SLOPE = 0.2      # GATConv default LeakyReLU slope
NEG_INF = -1e30      # mask value for non-edges (f32: exp(NEG_INF - m) == 0.0 exactly)
LANE = 128           # TPU lane width


def _round_up(v, m):
    return (v + m - 1) // m * m


def gat_layer_kernel(xs_ref, xd_ref, adj_ref, w_ref, as_ref, ad_ref, b_ref, out_ref):
    """One GATConv (heads=1) + ReLU for one tile of destination rows.

    xs_ref:  (N, F)  all (source) node features          [resident across grid]
    xd_ref:  (T, F)  this tile's destination node features
    adj_ref: (T, N)  bf16 mask, adj[i, j] = 1 iff edge j -> i (self-loops added)
    w_ref:   (F, F)  zero-padded linear weight
    as_ref, ad_ref, b_ref: (1, F)  att_src, att_dst, bias (zero-padded)
    out_ref: (T, F)
    """
    w = w_ref[...]
    h_src = jnp.dot(xs_ref[...], w, preferred_element_type=jnp.float32)   # (N, F)
    h_dst = jnp.dot(xd_ref[...], w, preferred_element_type=jnp.float32)   # (T, F)

    # e[i, j] = LeakyReLU(<h_dst_i, att_dst> + <h_src_j, att_src>)
    a_dst = lax.dot_general(h_dst, ad_ref[...], (((1,), (1,)), ((), ())),
                            preferred_element_type=jnp.float32)           # (T, 1)
    a_src = lax.dot_general(as_ref[...], h_src, (((1,), (1,)), ((), ())),
                            preferred_element_type=jnp.float32)           # (1, N)
    e = a_dst + a_src
    e = jnp.where(e > 0, e, NEG_SLOPE * e)                                # LeakyReLU(0.2)
    e = jnp.where(adj_ref[...] > 0, e, NEG_INF)                           # single mask pass

    m = jnp.max(e, axis=-1, keepdims=True)                                # per-dst max
    # Masked entries: exp(NEG_INF - m) underflows to exactly 0.0 -> no second select.
    p = jnp.exp(e - m)                                                    # (T, N)
    denom = jnp.sum(p, axis=-1, keepdims=True)                            # >= 1 (self-loop)

    agg = jnp.dot(p, h_src, preferred_element_type=jnp.float32)           # (T, F)
    # Deferred softmax normalisation: one (T,1) EUP reciprocal instead of a (T,N) divide.
    out = agg * pl.reciprocal(denom, approx=True) + b_ref[...]
    out_ref[...] = jnp.maximum(out, 0.0)                                  # ReLU


def _gat_relu_pallas(x, adj_bf16, w, att_src, att_dst, bias, *, tile):
    """One GATConv+ReLU layer as a pallas_call tiled over destination rows."""
    n_pad, f_pad = x.shape
    grid = (n_pad // tile,)

    def full(shape):
        return pl.BlockSpec(shape, lambda i: (0, 0))

    return pl.pallas_call(
        gat_layer_kernel,
        out_shape=jax.ShapeDtypeStruct((n_pad, f_pad), jnp.float32),
        grid=grid,
        in_specs=[
            full((n_pad, f_pad)),                            # x, all source nodes (resident)
            pl.BlockSpec((tile, f_pad), lambda i: (i, 0)),   # x, dst-row tile
            pl.BlockSpec((tile, n_pad), lambda i: (i, 0)),   # adjacency dst-row tile (bf16)
            full((f_pad, f_pad)),                            # W
            full((1, f_pad)),                                # att_src
            full((1, f_pad)),                                # att_dst
            full((1, f_pad)),                                # bias
        ],
        out_specs=pl.BlockSpec((tile, f_pad), lambda i: (i, 0)),
        compiler_params=pltpu.CompilerParams(
            dimension_semantics=("parallel",),               # dst tiles are independent
            vmem_limit_bytes=32 * 1024 * 1024,               # above 16 MiB v5e scoped default
        ),
    )(x, x, adj_bf16, w, att_src, att_dst, bias)


@jax.jit
def graph_encoder(x, adj, w1, as1, ad1, b1, w2, as2, ad2, b2):
    """ReLU(GAT2(ReLU(GAT1(x)))) with dense adjacency mask `adj` (N_dst, N_src)."""
    n, f_in = x.shape
    f_out = w1.shape[1]
    f_pad = _round_up(max(f_in, f_out), LANE)                # lane-dense features
    tile = LANE if n >= LANE else _round_up(n, 16)           # dst-row tile (bf16-friendly)
    n_pad = _round_up(n, tile)

    def pad2(a, rows, cols):
        return jnp.pad(a, ((0, rows - a.shape[0]), (0, cols - a.shape[1])))

    x_p = pad2(x.astype(jnp.float32), n_pad, f_pad)
    # adj holds only 0/1 -> exact in bf16; used only in `> 0` compares.
    adj_p = pad2(adj, n_pad, n_pad).astype(jnp.bfloat16)

    w1_p, w2_p = pad2(w1, f_pad, f_pad), pad2(w2, f_pad, f_pad)
    as1_p, ad1_p, b1_p = pad2(as1, 1, f_pad), pad2(ad1, 1, f_pad), pad2(b1, 1, f_pad)
    as2_p, ad2_p, b2_p = pad2(as2, 1, f_pad), pad2(ad2, 1, f_pad), pad2(b2, 1, f_pad)

    h1 = _gat_relu_pallas(x_p, adj_p, w1_p, as1_p, ad1_p, b1_p, tile=tile)
    h2 = _gat_relu_pallas(h1, adj_p, w2_p, as2_p, ad2_p, b2_p, tile=tile)
    return h2[:n, :f_out]


# ----------------------------- pure-JAX reference -----------------------------

def _gat_relu_reference(h_in, adj, w, att_src, att_dst, bias):
    h = jnp.dot(h_in, w, preferred_element_type=jnp.float32)
    a_dst = jnp.dot(h, att_dst.T, preferred_element_type=jnp.float32)     # (N, 1)
    a_src = jnp.dot(h, att_src.T, preferred_element_type=jnp.float32).T   # (1, N)
    e = a_dst + a_src
    e = jnp.where(e > 0, e, NEG_SLOPE * e)
    e = jnp.where(adj > 0, e, NEG_INF)
    m = jnp.max(e, axis=-1, keepdims=True)
    p = jnp.where(adj > 0, jnp.exp(e - m), 0.0)
    attn = p / jnp.sum(p, axis=-1, keepdims=True)
    out = jnp.dot(attn, h, preferred_element_type=jnp.float32) + bias
    return jnp.maximum(out, 0.0)


def graph_encoder_ref(x, adj, w1, as1, ad1, b1, w2, as2, ad2, b2):
    h1 = _gat_relu_reference(x, adj, w1, as1, ad1, b1)
    return _gat_relu_reference(h1, adj, w2, as2, ad2, b2)


def build_dense_adj(edge_index, num_nodes):
    """edge_index: (2, E) int32 rows = [src, dst]; adj[dst, src] = 1 plus self-loops."""
    # TODO(synk): duplicate (src, dst) edges collapse to a single dense entry; PyG's
    # sparse scatter softmax would count them twice (multigraph semantics differ).
    src, dst = edge_index[0], edge_index[1]
    adj = jnp.zeros((num_nodes, num_nodes), jnp.float32)
    adj = adj.at[dst, src].set(1.0)
    idx = jnp.arange(num_nodes)
    adj = adj.at[idx, idx].set(1.0)  # add_self_loops=True
    return adj


if __name__ == "__main__":
    # Small shapes consistent with the module (input_size == output_size so that
    # layer2(input_size, output_size) composes with layer1's output, as in JGRM).
    N = 256          # nodes (2 destination-row tiles of 128)
    F_IN = 32        # input_size
    F_OUT = 32       # output_size
    E = 1024         # edges

    key = jax.random.PRNGKey(0)
    (k_x, k_src, k_dst, k_w1, k_a1s, k_a1d, k_b1,
     k_w2, k_a2s, k_a2d, k_b2) = jax.random.split(key, 11)

    x = jax.random.normal(k_x, (N, F_IN), dtype=jnp.float32)
    edge_index = jnp.stack([
        jax.random.randint(k_src, (E,), 0, N, dtype=jnp.int32),
        jax.random.randint(k_dst, (E,), 0, N, dtype=jnp.int32),
    ])
    adj = build_dense_adj(edge_index, N)

    # Deterministic synthetic GATConv parameters (lin weight, att_src, att_dst, bias).
    glorot = (2.0 / (F_IN + F_OUT)) ** 0.5
    w1 = jax.random.normal(k_w1, (F_IN, F_OUT), jnp.float32) * glorot
    as1 = jax.random.normal(k_a1s, (1, F_OUT), jnp.float32) * glorot
    ad1 = jax.random.normal(k_a1d, (1, F_OUT), jnp.float32) * glorot
    b1 = jax.random.normal(k_b1, (1, F_OUT), jnp.float32) * 0.1
    w2 = jax.random.normal(k_w2, (F_OUT, F_OUT), jnp.float32) * glorot
    as2 = jax.random.normal(k_a2s, (1, F_OUT), jnp.float32) * glorot
    ad2 = jax.random.normal(k_a2d, (1, F_OUT), jnp.float32) * glorot
    b2 = jax.random.normal(k_b2, (1, F_OUT), jnp.float32) * 0.1

    out = graph_encoder(x, adj, w1, as1, ad1, b1, w2, as2, ad2, b2)
    out = jax.block_until_ready(out)

    ref = graph_encoder_ref(x, adj, w1, as1, ad1, b1, w2, as2, ad2, b2)
    assert out.shape == (N, F_OUT)
    assert jnp.allclose(out, ref, rtol=2e-2, atol=2e-2), \
        "Pallas kernel mismatch vs JAX reference"

    print("KERNEL_OK")
</pallas_src>

<mosaic_0001>
module attributes {stable_mosaic.version = 11 : i64} {
  func.func @gat_layer_kernel(%arg0: i32, %arg1: memref<256x128xf32, #tpu.memory_space<vmem>>, %arg2: memref<128x128xf32, #tpu.memory_space<vmem>>, %arg3: memref<128x256xbf16, #tpu.memory_space<vmem>>, %arg4: memref<128x128xf32, #tpu.memory_space<vmem>>, %arg5: memref<1x128xf32, #tpu.memory_space<vmem>>, %arg6: memref<1x128xf32, #tpu.memory_space<vmem>>, %arg7: memref<1x128xf32, #tpu.memory_space<vmem>>, %arg8: memref<128x128xf32, #tpu.memory_space<vmem>>) attributes {dimension_semantics = [#tpu.dimension_semantics<parallel>], iteration_bounds = array<i64: 2>, scalar_prefetch = 0 : i64, scratch_operands = 0 : i64, tpu.core_type = #tpu.core_type<tc>, window_params = [{pipeline_mode = #tpu.pipeline_mode<synchronous>, transform_indices = @transform_0, window_bounds = array<i64: 256, 128>}, {transform_indices = @transform_1, window_bounds = array<i64: 128, 128>}, {transform_indices = @transform_2, window_bounds = array<i64: 128, 256>}, {pipeline_mode = #tpu.pipeline_mode<synchronous>, transform_indices = @transform_3, window_bounds = array<i64: 128, 128>}, {pipeline_mode = #tpu.pipeline_mode<synchronous>, transform_indices = @transform_4, window_bounds = array<i64: 1, 128>}, {pipeline_mode = #tpu.pipeline_mode<synchronous>, transform_indices = @transform_5, window_bounds = array<i64: 1, 128>}, {pipeline_mode = #tpu.pipeline_mode<synchronous>, transform_indices = @transform_6, window_bounds = array<i64: 1, 128>}, {transform_indices = @transform_7, window_bounds = array<i64: 128, 128>}]} {
    %c0 = arith.constant 0 : index
    %c0_0 = arith.constant 0 : index
    %0 = vector.load %arg4[%c0, %c0_0] : memref<128x128xf32, #tpu.memory_space<vmem>>, vector<128x128xf32>
    %c0_1 = arith.constant 0 : index
    %c0_2 = arith.constant 0 : index
    %1 = vector.load %arg1[%c0_1, %c0_2] : memref<256x128xf32, #tpu.memory_space<vmem>>, vector<256x128xf32>
    %cst = arith.constant dense<0.000000e+00> : vector<256x128xf32>
    %2 = tpu.matmul %1, %0, %cst {dimension_numbers = #tpu.dot_dimension_numbers<[1], [0], [0], [1], [0, 0, 1, 1], [], []>} : vector<256x128xf32>, vector<128x128xf32>, vector<256x128xf32> -> vector<256x128xf32>
    %c0_3 = arith.constant 0 : index
    %c0_4 = arith.constant 0 : index
    %3 = vector.load %arg2[%c0_3, %c0_4] : memref<128x128xf32, #tpu.memory_space<vmem>>, vector<128x128xf32>
    %cst_5 = arith.constant dense<0.000000e+00> : vector<128x128xf32>
    %4 = tpu.matmul %3, %0, %cst_5 {dimension_numbers = #tpu.dot_dimension_numbers<[1], [0], [0], [1], [0, 0, 1, 1], [], []>} : vector<128x128xf32>, vector<128x128xf32>, vector<128x128xf32> -> vector<128x128xf32>
    %c0_6 = arith.constant 0 : index
    %c0_7 = arith.constant 0 : index
    %5 = vector.load %arg6[%c0_6, %c0_7] : memref<1x128xf32, #tpu.memory_space<vmem>>, vector<1x128xf32>
    %cst_8 = arith.constant dense<0.000000e+00> : vector<128x1xf32>
    %6 = tpu.matmul %4, %5, %cst_8 {dimension_numbers = #tpu.dot_dimension_numbers<[1], [1], [0], [0], [0, 0, 1, 0], [], []>} : vector<128x128xf32>, vector<1x128xf32>, vector<128x1xf32> -> vector<128x1xf32>
    %c0_9 = arith.constant 0 : index
    %c0_10 = arith.constant 0 : index
    %7 = vector.load %arg5[%c0_9, %c0_10] : memref<1x128xf32, #tpu.memory_space<vmem>>, vector<1x128xf32>
    %cst_11 = arith.constant dense<0.000000e+00> : vector<1x256xf32>
    %8 = tpu.matmul %7, %2, %cst_11 {dimension_numbers = #tpu.dot_dimension_numbers<[1], [1], [0], [0], [0, 0, 1, 0], [], []>} : vector<1x128xf32>, vector<256x128xf32>, vector<1x256xf32> -> vector<1x256xf32>
    %9 = vector.broadcast %6 : vector<128x1xf32> to vector<128x256xf32>
    %10 = vector.broadcast %8 : vector<1x256xf32> to vector<128x256xf32>
    %11 = arith.addf %9, %10 : vector<128x256xf32>
    %cst_12 = arith.constant 0.000000e+00 : f32
    %12 = vector.broadcast %cst_12 : f32 to vector<128x256xf32>
    %13 = arith.cmpf ogt, %11, %12 : vector<128x256xf32>
    %cst_13 = arith.constant 2.000000e-01 : f32
    %14 = vector.broadcast %cst_13 : f32 to vector<128x256xf32>
    %15 = arith.mulf %14, %11 : vector<128x256xf32>
    %16 = arith.select %13, %11, %15 : vector<128x256xi1>, vector<128x256xf32>
    %c0_14 = arith.constant 0 : index
    %c0_15 = arith.constant 0 : index
    %17 = vector.load %arg3[%c0_14, %c0_15] : memref<128x256xbf16, #tpu.memory_space<vmem>>, vector<128x256xbf16>
    %cst_16 = arith.constant 0.000000e+00 : bf16
    %18 = vector.broadcast %cst_16 : bf16 to vector<128x256xbf16>
    %19 = arith.cmpf ogt, %17, %18 : vector<128x256xbf16>
    %cst_17 = arith.constant -1.000000e+30 : f32
    %20 = vector.broadcast %cst_17 : f32 to vector<128x256xf32>
    %21 = arith.select %19, %16, %20 : vector<128x256xi1>, vector<128x256xf32>
    %cst_18 = arith.constant dense<0xFF800000> : vector<128xf32>
    %22 = vector.multi_reduction <maximumf>, %21, %cst_18 [1] : vector<128x256xf32> to vector<128xf32>
    %23 = vector.shape_cast %22 : vector<128xf32> to vector<128x1xf32>
    %24 = vector.broadcast %23 : vector<128x1xf32> to vector<128x256xf32>
    %25 = arith.subf %21, %24 : vector<128x256xf32>
    %26 = math.exp %25 : vector<128x256xf32>
    %cst_19 = arith.constant dense<0.000000e+00> : vector<128xf32>
    %27 = vector.multi_reduction <add>, %26, %cst_19 [1] : vector<128x256xf32> to vector<128xf32>
    %28 = vector.shape_cast %27 : vector<128xf32> to vector<128x1xf32>
    %cst_20 = arith.constant dense<0.000000e+00> : vector<128x128xf32>
    %29 = tpu.matmul %26, %2, %cst_20 {dimension_numbers = #tpu.dot_dimension_numbers<[1], [0], [0], [1], [0, 0, 1, 1], [], []>} : vector<128x256xf32>, vector<256x128xf32>, vector<128x128xf32> -> vector<128x128xf32>
    %30 = tpu.reciprocal %28 {approx = true} : vector<128x1xf32> -> vector<128x1xf32>
    %31 = vector.broadcast %30 : vector<128x1xf32> to vector<128x128xf32>
    %32 = arith.mulf %29, %31 : vector<128x128xf32>
    %c0_21 = arith.constant 0 : index
    %c0_22 = arith.constant 0 : index
    %33 = vector.load %arg7[%c0_21, %c0_22] : memref<1x128xf32, #tpu.memory_space<vmem>>, vector<1x128xf32>
    %34 = vector.broadcast %33 : vector<1x128xf32> to vector<128x128xf32>
    %35 = arith.addf %32, %34 : vector<128x128xf32>
    %cst_23 = arith.constant 0.000000e+00 : f32
    %36 = vector.broadcast %cst_23 : f32 to vector<128x128xf32>
    %37 = arith.maximumf %35, %36 : vector<128x128xf32>
    %c0_24 = arith.constant 0 : index
    %c0_25 = arith.constant 0 : index
    %38 = vector.load %arg8[%c0_24, %c0_25] : memref<128x128xf32, #tpu.memory_space<vmem>>, vector<128x128xf32>
    tpu.vector_store %arg8[%c0_24, %c0_25], %37 {strides = array<i32>} : memref<128x128xf32, #tpu.memory_space<vmem>>, vector<128x128xf32>,
    return
  }
  func.func @transform_0(%arg0: i32) -> (i32, i32) {
    %c0_i32 = arith.constant 0 : i32
    %c0_i32_0 = arith.constant 0 : i32
    %c0_i32_1 = arith.constant 0 : i32
    return %c0_i32, %c0_i32_0 : i32, i32
  }
  func.func @transform_1(%arg0: i32) -> (i32, i32) {
    %c0_i32 = arith.constant 0 : i32
    %c0_i32_0 = arith.constant 0 : i32
    return %arg0, %c0_i32 : i32, i32
  }
  func.func @transform_2(%arg0: i32) -> (i32, i32) {
    %c0_i32 = arith.constant 0 : i32
    %c0_i32_0 = arith.constant 0 : i32
    return %arg0, %c0_i32 : i32, i32
  }
  func.func @transform_3(%arg0: i32) -> (i32, i32) {
    %c0_i32 = arith.constant 0 : i32
    %c0_i32_0 = arith.constant 0 : i32
    %c0_i32_1 = arith.constant 0 : i32
    return %c0_i32, %c0_i32_0 : i32, i32
  }
  func.func @transform_4(%arg0: i32) -> (i32, i32) {
    %c0_i32 = arith.constant 0 : i32
    %c0_i32_0 = arith.constant 0 : i32
    %c0_i32_1 = arith.constant 0 : i32
    return %c0_i32, %c0_i32_0 : i32, i32
  }
  func.func @transform_5(%arg0: i32) -> (i32, i32) {
    %c0_i32 = arith.constant 0 : i32
    %c0_i32_0 = arith.constant 0 : i32
    %c0_i32_1 = arith.constant 0 : i32
    return %c0_i32, %c0_i32_0 : i32, i32
  }
  func.func @transform_6(%arg0: i32) -> (i32, i32) {
    %c0_i32 = arith.constant 0 : i32
    %c0_i32_0 = arith.constant 0 : i32
    %c0_i32_1 = arith.constant 0 : i32
    return %c0_i32, %c0_i32_0 : i32, i32
  }
  func.func @transform_7(%arg0: i32) -> (i32, i32) {
    %c0_i32 = arith.constant 0 : i32
    %c0_i32_0 = arith.constant 0 : i32
    return %arg0, %c0_i32 : i32, i32
  }
}

</mosaic_0001>

<bundles_post_ra>
// kernel: graph_encoder.2
= control target key start
LH: loop header
LB: loop body
LE: loop exit
PB: predicated region body
PF: predicated region fallthrough
CT: control target
= control target key end

     0   :  { %s2272_s24 = smov 0   ;;  %s3184_s0 = inlined_call_operand.vmem [shape: f32[256,128], index: 0, kind: input, shape index: {}, may-alias: {0,1}]   ;;  %s3185_s1 = inlined_call_operand.vmem [shape: f32[256,128], index: 1, kind: input, shape index: {}, may-alias: {0,1}]   ;;  %s3186_s2 = inlined_call_operand.vmem [shape: bf16[256,256], index: 2, kind: input, shape index: {}]   ;;  %s3187_s3 = inlined_call_operand.vmem [shape: f32[128,128], index: 3, kind: input, shape index: {}]   ;;  %s3188_s4 = inlined_call_operand.vmem [shape: f32[1,128], index: 4, kind: input, shape index: {}]   ;;  %s3189_s5 = inlined_call_operand.vmem [shape: f32[1,128], index: 5, kind: input, shape index: {}]   ;;  %s3190_s6 = inlined_call_operand.vmem [shape: f32[1,128], index: 6, kind: input, shape index: {}]   ;;  %s3191_s7 = inlined_call_operand.vmem [shape: f32[256,128], index: 7, kind: output, shape index: {}]  }
   0x1 LB: > { %s1643_s25 = sadd.s32 4294967295, %s2229_s24   ;;  %p1647_p0 = scmp.ge.s32.totalorder %s2229_s24, 1  ;;  %s2229_s24 = sphi %s2272_s24, %s17_s24  }
   0x2   : > { %p250_p1 = scmp.lt.s32.totalorder %s2229_s24, 3 }
   0x4   : > { %p251_p2 = pnand %p1647_p0, %p250_p1 }
   0x5   : > { %v310_v0 = vld [vmem:[%s3187_s3] sm:$0xff] (!%p251_p2)  ;;  %v311_v1 = vld [vmem:[%s3187_s3 + $0x8] sm:$0xff] (!%p251_p2)  ;;  %v312_v2 = vld [vmem:[%s3187_s3 + $0x10] sm:$0xff] (!%p251_p2)  ;;  %s1648_s9 = sshll.u32 (!%p251_p2), %s1643_s25, 4 }
   0x6   : > { %254 = sbr.rel (%p251_p2) target bundleno = 1018 (0x3fa), region = 48  ;;  %v1990_v3 = vpack.c.bf16 (!%p251_p2), %v311_v1, %v310_v0  ;;  %v313_v4 = vld [vmem:[%s3187_s3 + $0x18] sm:$0xff] (!%p251_p2)  ;;  %v314_v6 = vld [vmem:[%s3187_s3 + $0x20] sm:$0xff] (!%p251_p2)  ;;  %v315_v7 = vld [vmem:[%s3187_s3 + $0x28] sm:$0xff] (!%p251_p2)  ;;  %p289_p3 = scmp.lt.s32.totalorder (!%p251_p2), %s1648_s9, 31 }
   0x7   : > { %v1994_v5 = vpack.c.bf16 (!%p251_p2), %v313_v4, %v312_v2  ;;  %v1998_v8 = vpack.c.bf16 (!%p251_p2), %v315_v7, %v314_v6  ;;  %v326_v9 = vld [vmem:[%s3184_s0] sm:$0xff] (!%p251_p2)  ;;  %v316_v10 = vld [vmem:[%s3187_s3 + $0x30] sm:$0xff] (!%p251_p2)  ;;  %v317_v11 = vld [vmem:[%s3187_s3 + $0x38] sm:$0xff] (!%p251_p2) }
   0x8   : > { %1991 = vmatprep.subr.bf16.mxu0 (!%p251_p2), %v1990_v3  ;;  %2023 = vmatprep.subr.bf16.mxu1 (!%p251_p2), %v1990_v3  ;;  %v2002_v12 = vpack.c.bf16 (!%p251_p2), %v317_v11, %v316_v10  ;;  %v318_v13 = vld [vmem:[%s3187_s3 + $0x40] sm:$0xff] (!%p251_p2)  ;;  %v319_v14 = vld [vmem:[%s3187_s3 + $0x48] sm:$0xff] (!%p251_p2)  ;;  %v320_v16 = vld [vmem:[%s3187_s3 + $0x50] sm:$0xff] (!%p251_p2) }
   0x9   : > { %1993 = vmatpush3.bf16.msra.mxu0 (!%p251_p2), %v1990_v3  ;;  %2025 = vmatpush3.bf16.msra.mxu1 (!%p251_p2), %v1990_v3  ;;  %v2006_v15 = vpack.c.bf16 (!%p251_p2), %v319_v14, %v318_v13  ;;  %v321_v17 = vld [vmem:[%s3187_s3 + $0x58] sm:$0xff] (!%p251_p2)  ;;  %v322_v20 = vld [vmem:[%s3187_s3 + $0x60] sm:$0xff] (!%p251_p2)  ;;  %v323_v21 = vld [vmem:[%s3187_s3 + $0x68] sm:$0xff] (!%p251_p2) }
   0xa   : > { %1995 = vmatprep.subr.bf16.mxu0 (!%p251_p2), %v1994_v5  ;;  %2027 = vmatprep.subr.bf16.mxu1 (!%p251_p2), %v1994_v5  ;;  %v2010_v19 = vpack.c.bf16 (!%p251_p2), %v321_v17, %v320_v16  ;;  %v2014_v22 = vpack.c.bf16 (!%p251_p2), %v323_v21, %v322_v20  ;;  %v324_v23 = vld [vmem:[%s3187_s3 + $0x70] sm:$0xff] (!%p251_p2)  ;;  %v325_v24 = vld [vmem:[%s3187_s3 + $0x78] sm:$0xff] (!%p251_p2)  ;;  %v327_v26 = vld [vmem:[%s3184_s0 + $0x8] sm:$0xff] (!%p251_p2) }
   0xb   : > { %1886 = vmatprep.mubr.f32.mxu0 (!%p251_p2), %v326_v9  ;;  %v2018_v25 = vpack.c.bf16 (!%p251_p2), %v325_v24, %v324_v23  ;;  %v328_v28 = vld [vmem:[%s3184_s0 + $0x10] sm:$0xff] (!%p251_p2)  ;;  %v329_v30 = vld [vmem:[%s3184_s0 + $0x18] sm:$0xff] (!%p251_p2)  ;;  %v330_v32 = vld [vmem:[%s3184_s0 + $0x20] sm:$0xff] (!%p251_p2) }
   0xc   : > { %v331_v34 = vld [vmem:[%s3184_s0 + $0x28] sm:$0xff] (!%p251_p2)  ;;  %v332_v36 = vld [vmem:[%s3184_s0 + $0x30] sm:$0xff] (!%p251_p2)  ;;  %v333_v38 = vld [vmem:[%s3184_s0 + $0x38] sm:$0xff] (!%p251_p2) }
   0xd   : > { %s3275_s9 = smov (!%p289_p3, %s1648_s9), 31  ;;  %1997 = vmatpush3.bf16.msra.mxu0 %v1994_v5  ;;  %2029 = vmatpush3.bf16.msra.mxu1 %v1994_v5  ;;  %v334_v40 = vld [vmem:[%s3184_s0 + $0x40] sm:$0xff]  ;;  %v335_v42 = vld [vmem:[%s3184_s0 + $0x48] sm:$0xff]  ;;  %v336_v44 = vld [vmem:[%s3184_s0 + $0x50] sm:$0xff] }
   0xe   : > { %1999 = vmatprep.subr.bf16.mxu0 %v1998_v8  ;;  %2031 = vmatprep.subr.bf16.mxu1 %v1998_v8  ;;  %s2313_s27 = sshll.u32 %s3275_s9, 3  ;;  %v337_v46 = vld [vmem:[%s3184_s0 + $0x58] sm:$0xff]  ;;  %v338_v48 = vld [vmem:[%s3184_s0 + $0x60] sm:$0xff]  ;;  %v339_v50 = vld [vmem:[%s3184_s0 + $0x68] sm:$0xff] }
   0xf   : > { %s2319_s30 = scalar_lea.vmem %s3185_s1, %s2313_s27  ;;  %v340_v52 = vld [vmem:[%s3184_s0 + $0x70] sm:$0xff]  ;;  %v341_v54 = vld [vmem:[%s3184_s0 + $0x78] sm:$0xff]  ;;  %v342_v56 = vld [vmem:[%s3184_s0 + $0x80] sm:$0xff]  ;;  %s2524_s28 = scalar_lea.vmem %s3186_s2, %s2313_s27 }
  0x10   : > { %v583_v18 = vld [vmem:[%s2319_s30] sm:$0xff]  ;;  %v584_v27 = vld [vmem:[%s2319_s30 + $0x8] sm:$0xff]  ;;  %v585_v29 = vld [vmem:[%s2319_s30 + $0x10] sm:$0xff]  ;;  %s3148_s12 = scalar_lea.vmem %s3191_s7, %s2313_s27 }
  0x11   : > { %2001 = vmatpush3.bf16.msra.mxu0 %v1998_v8  ;;  %2033 = vmatpush3.bf16.msra.mxu1 %v1998_v8  ;;  %v586_v31 = vld [vmem:[%s2319_s30 + $0x18] sm:$0xff]  ;;  %v587_v33 = vld [vmem:[%s2319_s30 + $0x20] sm:$0xff]  ;;  %v588_v35 = vld [vmem:[%s2319_s30 + $0x28] sm:$0xff] }
  0x12   : > { %2003 = vmatprep.subr.bf16.mxu0 %v2002_v12  ;;  %2035 = vmatprep.subr.bf16.mxu1 %v2002_v12  ;;  %v589_v37 = vld [vmem:[%s2319_s30 + $0x30] sm:$0xff]  ;;  %v590_v39 = vld [vmem:[%s2319_s30 + $0x38] sm:$0xff]  ;;  %v591_v41 = vld [vmem:[%s2319_s30 + $0x40] sm:$0xff] }
  0x13   : > { %1966 = vmatprep.mubr.f32.mxu1 %v583_v18  ;;  %v592_v43 = vld [vmem:[%s2319_s30 + $0x48] sm:$0xff]  ;;  %v593_v45 = vld [vmem:[%s2319_s30 + $0x50] sm:$0xff]  ;;  %v594_v47 = vld [vmem:[%s2319_s30 + $0x58] sm:$0xff] }
  0x14   : > { %v595_v49 = vld [vmem:[%s2319_s30 + $0x60] sm:$0xff]  ;;  %v596_v51 = vld [vmem:[%s2319_s30 + $0x68] sm:$0xff]  ;;  %v597_v53 = vld [vmem:[%s2319_s30 + $0x70] sm:$0xff] }
  0x15   : > { %2005 = vmatpush3.bf16.msra.mxu0 %v2002_v12  ;;  %2037 = vmatpush3.bf16.msra.mxu1 %v2002_v12  ;;  %v598_v55 = vld [vmem:[%s2319_s30 + $0x78] sm:$0xff]  ;;  %v343_v57 = vld [vmem:[%s3184_s0 + $0x88] sm:$0xff]  ;;  %v344_v58 = vld [vmem:[%s3184_s0 + $0x90] sm:$0xff] }
  0x16   : > { %2007 = vmatprep.subr.bf16.mxu0 %v2006_v15  ;;  %2039 = vmatprep.subr.bf16.mxu1 %v2006_v15  ;;  %v345_v59 = vld [vmem:[%s3184_s0 + $0x98] sm:$0xff]  ;;  %v346_v60 = vld [vmem:[%s3184_s0 + $0xa0] sm:$0xff]  ;;  %v347_v61 = vld [vmem:[%s3184_s0 + $0xa8] sm:$0xff] }
  0x17   : > { %v348_v62 = vld [vmem:[%s3184_s0 + $0xb0] sm:$0xff]  ;;  %v349_v63 = vld [vmem:[%s3184_s0 + $0xb8] sm:$0xff]  ;;  %v350_v0 = vld [vmem:[%s3184_s0 + $0xc0] sm:$0xff] }
  0x18   : > { %v351_v1 = vld [vmem:[%s3184_s0 + $0xc8] sm:$0xff]  ;;  %v352_v2 = vld [vmem:[%s3184_s0 + $0xd0] sm:$0xff]  ;;  %v353_v3 = vld [vmem:[%s3184_s0 + $0xd8] sm:$0xff] }
  0x19   : > { %2009 = vmatpush3.bf16.msra.mxu0 %v2006_v15  ;;  %2041 = vmatpush3.bf16.msra.mxu1 %v2006_v15  ;;  %v354_v4 = vld [vmem:[%s3184_s0 + $0xe0] sm:$0xff]  ;;  %v355_v5 = vld [vmem:[%s3184_s0 + $0xe8] sm:$0xff]  ;;  %v356_v6 = vld [vmem:[%s3184_s0 + $0xf0] sm:$0xff] }
  0x1a   : > { %2011 = vmatprep.subr.bf16.mxu0 %v2010_v19  ;;  %2043 = vmatprep.subr.bf16.mxu1 %v2010_v19  ;;  %v357_v7 = vld [vmem:[%s3184_s0 + $0xf8] sm:$0xff]  ;;  %v2451_v8 = vld [vmem:[%s3188_s4] sm:$0x1] }
  0x1b   : > { %v2457_v9 = vld [vmem:[%s3189_s5] ss:$0 sm:$0xff] }
  0x1d   : > { %2013 = vmatpush3.bf16.msra.mxu0 %v2010_v19  ;;  %2045 = vmatpush3.bf16.msra.mxu1 %v2010_v19 }
  0x1e   : > { %2015 = vmatprep.subr.bf16.mxu0 %v2014_v22  ;;  %2047 = vmatprep.subr.bf16.mxu1 %v2014_v22 }
  0x21   : > { %2017 = vmatpush3.bf16.msra.mxu0 %v2014_v22  ;;  %2049 = vmatpush3.bf16.msra.mxu1 %v2014_v22 }
  0x22   : > { %2019 = vmatprep.subr.bf16.mxu0 %v2018_v25  ;;  %2051 = vmatprep.subr.bf16.mxu1 %v2018_v25 }
  0x25   : > { %2021 = vmatpush3.bf16.msra.mxu0 %v2018_v25  ;;  %2053 = vmatpush3.bf16.msra.mxu1 %v2018_v25 }
  0x28   : > { %1887 = vmatmul.mubr.f32.vlgmr.msra.gmra.mrb[0].mxu0 %v327_v26  ;;  %1967 = vmatmul.mubr.f32.vlgmr.msra.gmra.mrb[0].mxu1 %v584_v27 }
  0x29   : > { %1889 = vmatprep.mubr.f32.mxu0 %v328_v28  ;;  %1969 = vmatprep.mubr.f32.mxu1 %v585_v29 }
  0x2c   : > { %1890 = vmatmul.mubr.f32.gmra.mrb[2].mxu0 %v329_v30  ;;  %1970 = vmatmul.mubr.f32.gmra.mrb[2].mxu1 %v586_v31 }
  0x2d   : > { %1892 = vmatprep.mubr.f32.mxu0 %v330_v32  ;;  %1972 = vmatprep.mubr.f32.mxu1 %v587_v33 }
  0x30   : > { %1893 = vmatmul.mubr.f32.gmra.mrb[4].mxu0 %v331_v34  ;;  %1973 = vmatmul.mubr.f32.gmra.mrb[4].mxu1 %v588_v35 }
  0x31   : > { %1895 = vmatprep.mubr.f32.mxu0 %v332_v36  ;;  %1975 = vmatprep.mubr.f32.mxu1 %v589_v37 }
  0x34   : > { %1896 = vmatmul.mubr.f32.gmra.mrb[6].mxu0 %v333_v38  ;;  %1976 = vmatmul.mubr.f32.gmra.mrb[6].mxu1 %v590_v39 }
  0x35   : > { %1898 = vmatprep.mubr.f32.mxu0 %v334_v40  ;;  %1978 = vmatprep.mubr.f32.mxu1 %v591_v41 }
  0x38   : > { %1899 = vmatmul.mubr.f32.gmra.mrb[8].mxu0 %v335_v42  ;;  %1979 = vmatmul.mubr.f32.gmra.mrb[8].mxu1 %v592_v43 }
  0x39   : > { %1901 = vmatprep.mubr.f32.mxu0 %v336_v44  ;;  %1981 = vmatprep.mubr.f32.mxu1 %v593_v45 }
  0x3c   : > { %1902 = vmatmul.mubr.f32.gmra.mrb[10].mxu0 %v337_v46  ;;  %1982 = vmatmul.mubr.f32.gmra.mrb[10].mxu1 %v594_v47 }
  0x3d   : > { %1904 = vmatprep.mubr.f32.mxu0 %v338_v48  ;;  %1984 = vmatprep.mubr.f32.mxu1 %v595_v49 }
  0x40   : > { %1905 = vmatmul.mubr.f32.gmra.mrb[12].mxu0 %v339_v50  ;;  %1985 = vmatmul.mubr.f32.gmra.mrb[12].mxu1 %v596_v51 }
  0x41   : > { %1907 = vmatprep.mubr.f32.mxu0 %v340_v52  ;;  %1987 = vmatprep.mubr.f32.mxu1 %v597_v53 }
  0x44   : > { %1908 = vmatmul.mubr.f32.gmra.mrb[14].mxu0 %v341_v54  ;;  %1988 = vmatmul.mubr.f32.gmra.mrb[14].mxu1 %v598_v55 }
  0x45   : > { %1910 = vmatprep.mubr.f32.mxu0 %v342_v56 }
  0x48   : > { %1911 = vmatmul.mubr.f32.gmra.mrb[16].mxu0 %v343_v57 }
  0x49   : > { %1913 = vmatprep.mubr.f32.mxu0 %v344_v58 }
  0x4c   : > { %1914 = vmatmul.mubr.f32.gmra.mrb[18].mxu0 %v345_v59 }
  0x4d   : > { %1916 = vmatprep.mubr.f32.mxu0 %v346_v60 }
  0x50   : > { %1917 = vmatmul.mubr.f32.gmra.mrb[20].mxu0 %v347_v61 }
  0x51   : > { %1919 = vmatprep.mubr.f32.mxu0 %v348_v62 }
  0x54   : > { %1920 = vmatmul.mubr.f32.gmra.mrb[22].mxu0 %v349_v63 }
  0x55   : > { %1922 = vmatprep.mubr.f32.mxu0 %v350_v0 }
  0x58   : > { %1923 = vmatmul.mubr.f32.gmra.mrb[24].mxu0 %v351_v1 }
  0x59   : > { %1925 = vmatprep.mubr.f32.mxu0 %v352_v2 }
  0x5c   : > { %1926 = vmatmul.mubr.f32.gmra.mrb[26].mxu0 %v353_v3 }
  0x5d   : > { %1928 = vmatprep.mubr.f32.mxu0 %v354_v4 }
  0x60   : > { %1929 = vmatmul.mubr.f32.gmra.mrb[28].mxu0 %v355_v5 }
  0x61   : > { %1931 = vmatprep.mubr.f32.mxu0 %v356_v6 }
  0x64   : > { %1932 = vmatmul.mubr.f32.gmra.mrb[30].mxu0 %v357_v7 }
  0x65   : > { %1772 = vmatprep.mubr.f32.mxu0 %v2451_v8 }
  0xfb   : > { %v1888_v10 = vpop.f32.mrb[0].mxu0  ;;  %v1968_v11 = vpop.f32.mrb[0].mxu1 }
  0xfc   : > { %v424_v12 = vpop.f32.mrb[1].mxu0  ;;  %v665_v13 = vpop.f32.mrb[1].mxu1  ;;  %v752_v17 = vmul.f32 %v1968_v11, %v2457_v9 }
  0xfd   : > { %v2459_v14 = vpack.c.bf16 %v1888_v10, %v424_v12  ;;  %v751_v15 = vmul.f32 %v2457_v9, %v665_v13 }
  0xff   : > { %v1891_v16 = vpop.f32.mrb[2].mxu0  ;;  %v1971_v18 = vpop.f32.mrb[2].mxu1  ;;  %767 = vadd.xlane.f32.xlu0 %v751_v15 }
 0x100   : > { %v434_v19 = vpop.f32.mrb[3].mxu0  ;;  %v675_v20 = vpop.f32.mrb[3].mxu1  ;;  %v754_v24 = vmul.f32 %v1971_v18, %v2457_v9 }
 0x101   : > { %v2463_v21 = vpack.c.bf16 %v1891_v16, %v434_v19  ;;  %v753_v22 = vmul.f32 %v2457_v9, %v675_v20 }
 0x103   : > { %v1894_v23 = vpop.f32.mrb[4].mxu0  ;;  %771 = vadd.xlane.f32.xlu1 %v753_v22  ;;  %769 = vadd.xlane.f32.xlu0 %v752_v17  ;;  %v1974_v25 = vpop.f32.mrb[4].mxu1 }
 0x104   : > { %v444_v26 = vpop.f32.mrb[5].mxu0  ;;  %v685_v27 = vpop.f32.mrb[5].mxu1  ;;  %v756_v31 = vmul.f32 %v1974_v25, %v2457_v9 }
 0x105   : > { %v2467_v28 = vpack.c.bf16 %v1894_v23, %v444_v26  ;;  %v755_v29 = vmul.f32 %v2457_v9, %v685_v27 }
 0x107   : > { %v1897_v30 = vpop.f32.mrb[6].mxu0  ;;  %773 = vadd.xlane.f32.xlu1 %v754_v24  ;;  %775 = vadd.xlane.f32.xlu0 %v755_v29  ;;  %v1977_v32 = vpop.f32.mrb[6].mxu1 }
 0x108   : > { %v454_v33 = vpop.f32.mrb[7].mxu0  ;;  %v695_v34 = vpop.f32.mrb[7].mxu1  ;;  %v758_v38 = vmul.f32 %v1977_v32, %v2457_v9 }
 0x109   : > { %v2471_v35 = vpack.c.bf16 %v1897_v30, %v454_v33  ;;  %v757_v36 = vmul.f32 %v2457_v9, %v695_v34 }
 0x10b   : > { %v1900_v37 = vpop.f32.mrb[8].mxu0  ;;  %777 = vadd.xlane.f32.xlu1 %v756_v31  ;;  %779 = vadd.xlane.f32.xlu0 %v757_v36  ;;  %v1980_v39 = vpop.f32.mrb[8].mxu1  ;;  %v1007_v36 = vld [vmem:[%s2524_s28] sm:$0xff] }
 0x10c   : > { %v464_v40 = vpop.f32.mrb[9].mxu0  ;;  %v705_v41 = vpop.f32.mrb[9].mxu1  ;;  %v760_v45 = vmul.f32 %v1980_v39, %v2457_v9  ;;  %v1010_v39 = vld [vmem:[%s2524_s28 + $0x18] sm:$0xff]  ;;  %vm1023_vm1 = vcmp.gt.bf16.partialorder %v1007_v36, 0 }
 0x10d   : > { %v2475_v42 = vpack.c.bf16 %v1900_v37, %v464_v40  ;;  %v759_v43 = vmul.f32 %v2457_v9, %v705_v41  ;;  %v1009_v40 = vld [vmem:[%s2524_s28 + $0x10] sm:$0xff]  ;;  %v1012_v41 = vld [vmem:[%s2524_s28 + $0x28] sm:$0xff]  ;;  %vm1026_vm2 = vcmp.gt.bf16.partialorder %v1010_v39, 0 }
 0x10e   : > { %vm1025_vm3 = vcmp.gt.bf16.partialorder %v1009_v40, 0  ;;  %vm1028_vm4 = vcmp.gt.bf16.partialorder %v1012_v41, 0 }
 0x10f   : > { %v1903_v44 = vpop.f32.mrb[10].mxu0  ;;  %781 = vadd.xlane.f32.xlu1 %v758_v38  ;;  %783 = vadd.xlane.f32.xlu0 %v759_v43  ;;  %v1983_v46 = vpop.f32.mrb[10].mxu1  ;;  %v1011_v43 = vld [vmem:[%s2524_s28 + $0x20] sm:$0xff] }
 0x110   : > { %v474_v47 = vpop.f32.mrb[11].mxu0  ;;  %v715_v48 = vpop.f32.mrb[11].mxu1  ;;  %v762_v52 = vmul.f32 %v1983_v46, %v2457_v9  ;;  %vm1027_vm5 = vcmp.gt.bf16.partialorder %v1011_v43, 0 }
 0x111   : > { %v2479_v49 = vpack.c.bf16 %v1903_v44, %v474_v47  ;;  %v761_v50 = vmul.f32 %v2457_v9, %v715_v48  ;;  %v2231_v44 = vmov 0   ;;  %v1014_v47 = vld [vmem:[%s2524_s28 + $0x38] sm:$0xff] }
 0x112   : > { %v2542_v46 = vsel %vm1023_vm1, 65537, %v2231_v44  ;;  %vm1030_vm6 = vcmp.gt.bf16.partialorder %v1014_v47, 0 }
 0x113   : > { %v1906_v51 = vpop.f32.mrb[12].mxu0  ;;  %785 = vadd.xlane.f32.xlu1 %v760_v45  ;;  %787 = vadd.xlane.f32.xlu0 %v761_v50  ;;  %v1986_v53 = vpop.f32.mrb[12].mxu1 }
 0x114   : > { %v484_v54 = vpop.f32.mrb[13].mxu0  ;;  %v725_v55 = vpop.f32.mrb[13].mxu1  ;;  %v764_v59 = vmul.f32 %v1986_v53, %v2457_v9  ;;  %v2555_v53 = vsel %vm1025_vm3, 65537, %v2231_v44 }
 0x115   : > { %v2483_v56 = vpack.c.bf16 %v1906_v51, %v484_v54  ;;  %v763_v57 = vmul.f32 %v2457_v9, %v725_v55  ;;  %v1016_v54 = vld [vmem:[%s2524_s28 + $0x48] sm:$0xff] }
 0x116   : > { %vm1032_vm8 = vcmp.gt.bf16.partialorder %v1016_v54, 0 }
 0x117   : > { %v1909_v58 = vpop.f32.mrb[14].mxu0  ;;  %789 = vadd.xlane.f32.xlu1 %v762_v52  ;;  %791 = vadd.xlane.f32.xlu0 %v763_v57  ;;  %v1989_v60 = vpop.f32.mrb[14].mxu1  ;;  %v2552_v52 = vsel %vm1026_vm2, 65537, %v2231_v44  ;;  %v2561_v57 = vsel %vm1028_vm4, 65537, %v2231_v44 }
 0x118   : > { %v494_v61 = vpop.f32.mrb[15].mxu0  ;;  %v735_v62 = vpop.f32.mrb[15].mxu1  ;;  %v766_v4 = vmul.f32 %v1989_v60, %v2457_v9  ;;  %v1056_v60 = vunpack.c.h.b16 %v2542_v46 }
 0x119   : > { %v2084_v63 = vpack.c.bf16 %v1909_v58, %v494_v61  ;;  %v765_v0 = vmul.f32 %v2457_v9, %v735_v62  ;;  %v1015_v58 = vld [vmem:[%s2524_s28 + $0x40] sm:$0xff]  ;;  %v2567_v61 = vsel %vm1027_vm5, 65537, %v2231_v44  ;;  %v1018_v62 = vld [vmem:[%s2524_s28 + $0x58] sm:$0xff] }
 0x11a   : > { %vm1031_vm9 = vcmp.gt.bf16.partialorder %v1015_v58, 0  ;;  %vm1034_vm10 = vcmp.gt.bf16.partialorder %v1018_v62, 0  ;;  %vm2642_vm3 = vcmp.ne.s32.totalorder %v1056_v60, 0 }
 0x11b   : > { %v1912_v1 = vpop.f32.mrb[16].mxu0  ;;  %793 = vadd.xlane.f32.xlu1 %v764_v59  ;;  %795 = vadd.xlane.f32.xlu0 %v765_v0  ;;  %v1062_v0 = vunpack.c.h.b16 %v2552_v52 }
 0x11c   : > { %v504_v2 = vpop.f32.mrb[17].mxu0 }
 0x11d   : > { %v2054_v3 = vpack.c.bf16 %v1912_v1, %v504_v2  ;;  %v1059_v1 = vunpack.c.l.b16 %v2555_v53  ;;  %v1017_v2 = vld [vmem:[%s2524_s28 + $0x50] sm:$0xff]  ;;  %vm2692_vm5 = vcmp.ne.s32.totalorder %v1062_v0, 0 }
 0x11e   : > { %vm1033_vm11 = vcmp.gt.bf16.partialorder %v1017_v2, 0 }
 0x11f   : > { %v1915_v5 = vpop.f32.mrb[18].mxu0  ;;  %2055 = vmatprep.subr.bf16.mxu0 %v2054_v3  ;;  %2087 = vmatprep.subr.bf16.mxu1 %v2054_v3  ;;  %v1020_v3 = vld [vmem:[%s2524_s28 + $0x68] sm:$0xff] }
 0x120   : > { %v514_v6 = vpop.f32.mrb[19].mxu0  ;;  %2057 = vmatpush3.bf16.xpose.msra.mxu0 %v2459_v14  ;;  %2089 = vmatpush3.bf16.msra.mxu1 %v2459_v14  ;;  %vm1036_vm12 = vcmp.gt.bf16.partialorder %v1020_v3, 0 }
 0x121   : > { %v2058_v7 = vpack.c.bf16 %v1915_v5, %v514_v6  ;;  %797 = vadd.xlane.f32.xlu1 %v766_v4  ;;  %v1060_v4 = vunpack.c.h.b16 %v2555_v53  ;;  %v1065_v5 = vunpack.c.l.b16 %v2561_v57  ;;  %v2578_v6 = vsel %vm1030_vm6, 65537, %v2231_v44 }
 0x123   : > { %v1918_v10 = vpop.f32.mrb[20].mxu0  ;;  %2091 = vmatprep.subr.bf16.mxu1 %v2058_v7  ;;  %2059 = vmatprep.subr.bf16.mxu0 %v2058_v7  ;;  %v1019_v7 = vld [vmem:[%s2524_s28 + $0x60] sm:$0xff] }
 0x124   : > { %v524_v11 = vpop.f32.mrb[21].mxu0  ;;  %2093 = vmatpush3.bf16.msra.mxu1 %v2463_v21  ;;  %vm1035_vm13 = vcmp.gt.bf16.partialorder %v1019_v7, 0 }
 0x125   : > { %v2062_v12 = vpack.c.bf16 %v1918_v10, %v524_v11  ;;  %v1022_v10 = vld [vmem:[%s2524_s28 + $0x78] sm:$0xff]  ;;  %v2618_v36 = vsel %vm1035_vm13, 65537, %v2231_v44  ;;  %vm2732_vm13 = vcmp.ne.s32.totalorder %v1065_v5, 0 }
 0x126   : > { %vm1038_vm14 = vcmp.gt.bf16.partialorder %v1022_v10, 0 }
 0x127   : > { %v1921_v13 = vpop.f32.mrb[22].mxu0  ;;  %2095 = vmatprep.subr.bf16.mxu1 %v2062_v12  ;;  %v2621_v39 = vsel %vm1038_vm14, 65537, %v2231_v44 }
 0x128   : > { %v534_v9 = vpop.f32.mrb[23].mxu0  ;;  %2061 = vmatpush3.bf16.xpose.msra.mxu0 %v2463_v21  ;;  %2097 = vmatpush3.bf16.msra.mxu1 %v2467_v28 }
 0x129   : > { %v2066_v15 = vpack.c.bf16 %v1921_v13, %v534_v9  ;;  %2063 = vmatprep.subr.bf16.mxu0 %v2062_v12  ;;  %v1066_v12 = vunpack.c.h.b16 %v2561_v57  ;;  %v1063_v13 = vunpack.c.l.b16 %v2567_v61 }
 0x12b   : > { %v1924_v16 = vpop.f32.mrb[24].mxu0  ;;  %2099 = vmatprep.subr.bf16.mxu1 %v2066_v15  ;;  %vm2738_vm14 = vcmp.ne.s32.totalorder %v1066_v12, 0 }
 0x12c   : > { %v544_v14 = vpop.f32.mrb[25].mxu0  ;;  %2101 = vmatpush3.bf16.msra.mxu1 %v2471_v35 }
 0x12d   : > { %v2070_v17 = vpack.c.bf16 %v1924_v16, %v544_v14  ;;  %v1064_v14 = vunpack.c.h.b16 %v2567_v61 }
 0x12f   : > { %v1927_v18 = vpop.f32.mrb[26].mxu0  ;;  %2103 = vmatprep.subr.bf16.mxu1 %v2070_v17 }
 0x130   : > { %v554_v19 = vpop.f32.mrb[27].mxu0  ;;  %2065 = vmatpush3.bf16.xpose.msra.mxu0 %v2467_v28  ;;  %2105 = vmatpush3.bf16.msra.mxu1 %v2475_v42 }
 0x131   : > { %v2074_v20 = vpack.c.bf16 %v1927_v18, %v554_v19  ;;  %2067 = vmatprep.subr.bf16.mxu0 %v2066_v15  ;;  %v1021_v15 = vld [vmem:[%s2524_s28 + $0x70] sm:$0xff]  ;;  %v1069_v18 = vunpack.c.l.b16 %v2578_v6  ;;  %v2600_v19 = vsel %vm1031_vm9, 65537, %v2231_v44  ;;  %vm2710_vm9 = vcmp.ne.s32.totalorder %v1060_v4, 0 }
 0x132   : > { %vm1037_vm15 = vcmp.gt.bf16.partialorder %v1021_v15, 0 }
 0x133   : > { %v1930_v21 = vpop.f32.mrb[28].mxu0  ;;  %2107 = vmatprep.subr.bf16.mxu1 %v2074_v20  ;;  %v2640_v54 = vsel %vm1037_vm15, 65537, %v2231_v44  ;;  %vm2757_vm15 = vcmp.ne.s32.totalorder %v1063_v13, 0 }
 0x134   : > { %v564_v22 = vpop.f32.mrb[29].mxu0  ;;  %2109 = vmatpush3.bf16.msra.mxu1 %v2479_v49 }
 0x135   : > { %v2078_v23 = vpack.c.bf16 %v1930_v21, %v564_v22  ;;  %v2605_v22 = vsel %vm1034_vm10, 65537, %v2231_v44 }
 0x137   : > { %v1933_v24 = vpop.f32.mrb[30].mxu0  ;;  %2111 = vmatprep.subr.bf16.mxu1 %v2078_v23 }
 0x138   : > { %v574_v25 = vpop.f32.mrb[31].mxu0  ;;  %2069 = vmatpush3.bf16.xpose.msra.mxu0 %v2471_v35  ;;  %2113 = vmatpush3.bf16.msra.mxu1 %v2483_v56  ;;  %v1008_v35 = vld [vmem:[%s2524_s28 + $0x8] sm:$0xff] }
 0x139   : > { %v2082_v26 = vpack.c.bf16 %v1933_v24, %v574_v25  ;;  %2071 = vmatprep.subr.bf16.mxu0 %v2070_v17  ;;  %vm1024_vm0 = vcmp.gt.bf16.partialorder %v1008_v35, 0  ;;  %v2596_v17 = vsel %vm1032_vm8, 65537, %v2231_v44  ;;  %v2610_v25 = vsel %vm1033_vm11, 65537, %v2231_v44 }
 0x13a   : > { %v2539_v45 = vsel %vm1024_vm0, 65537, %v2231_v44  ;;  %vm2704_vm8 = vcmp.ne.s32.totalorder %v1059_v1, 0  ;;  %v3244_v10 = vunpack.c.l.b16 %v2610_v25 }
 0x13b   : > { %2115 = vmatprep.subr.bf16.mxu1 %v2082_v26  ;;  %v1057_v55 = vunpack.c.l.b16 %v2539_v45  ;;  %v1058_v59 = vunpack.c.h.b16 %v2539_v45 }
 0x13c   : > { %2117 = vmatpush3.bf16.msra.mxu1 %v2084_v63 }
 0x13d   : > { %vm2623_vm0 = vcmp.ne.s32.totalorder %v1057_v55, 0  ;;  %vm2627_vm1 = vcmp.ne.s32.totalorder %v1058_v59, 0 }
 0x140   : > { %2073 = vmatpush3.bf16.xpose.msra.mxu0 %v2475_v42 }
 0x141   : > { %2075 = vmatprep.subr.bf16.mxu0 %v2074_v20  ;;  %v1070_v20 = vunpack.c.h.b16 %v2578_v6 }
 0x148   : > { %2077 = vmatpush3.bf16.xpose.msra.mxu0 %v2479_v49  ;;  %v1013_v49 = vld [vmem:[%s2524_s28 + $0x30] sm:$0xff] }
 0x149   : > { %2079 = vmatprep.subr.bf16.mxu0 %v2078_v23  ;;  %vm1029_vm7 = vcmp.gt.bf16.partialorder %v1013_v49, 0 }
 0x14a   : > { %v2588_v9 = vsel %vm1029_vm7, 65537, %v2231_v44 }
 0x150   : > { %2081 = vmatpush3.bf16.xpose.msra.mxu0 %v2483_v56  ;;  %v1055_v56 = vunpack.c.l.b16 %v2542_v46 }
 0x151   : > { %2083 = vmatprep.subr.bf16.mxu0 %v2082_v26  ;;  %v2613_v26 = vsel %vm1036_vm12, 65537, %v2231_v44 }
 0x152   : > { %vm2631_vm2 = vcmp.ne.s32.totalorder %v1055_v56, 0 }
 0x158   : > { %2085 = vmatpush3.bf16.xpose.msra.mxu0 %v2084_v63  ;;  %v1061_v63 = vunpack.c.l.b16 %v2552_v52 }
 0x15a   : > { %vm2676_vm4 = vcmp.ne.s32.totalorder %v1061_v63, 0 }
 0x15f   : > { %1773 = vmatmul.mubr.f32.vlgmr.msra.gmra.mrb[32].mxu0 %v2451_v8  ;;  %v871_v8 = vlaneseq }
 0x161   : > { %v2535_v42 = vshrl.u32 %v871_v8, 7 }
 0x163   : > { %v873_v51 = vsub.s32 0, %v2535_v42 }
 0x18c   : > { %v2506_v28 = vpop.xlane.xlu0 %767 }
 0x190   : > { %v2504_v27 = vpop.xlane.xlu1 %771  ;;  %v2510_v30 = vpop.xlane.xlu0 %769 }
 0x194   : > { %v2508_v29 = vpop.xlane.xlu1 %773  ;;  %v2514_v32 = vpop.xlane.xlu0 %775 }
 0x198   : > { %v2512_v31 = vpop.xlane.xlu1 %777  ;;  %v2518_v34 = vpop.xlane.xlu0 %779 }
 0x19c   : > { %v2516_v33 = vpop.xlane.xlu1 %781  ;;  %v2530_v38 = vpop.xlane.xlu0 %783 }
 0x1a0   : > { %v2528_v37 = vpop.xlane.xlu1 %785  ;;  %v2548_v50 = vpop.xlane.xlu0 %787 }
 0x1a4   : > { %v2545_v48 = vpop.xlane.xlu1 %789  ;;  %v2591_v16 = vpop.xlane.xlu0 %791 }
 0x1a8   : > { %v2582_v11 = vpop.xlane.xlu1 %793  ;;  %v796_v58 = vpop.xlane.xlu0 %795 }
 0x1ae   : > { %v798_v40 = vpop.xlane.xlu1 %797 }
 0x232   : > { %v866_v55 = vpop.f32.mrb[32].mxu0 }
 0x233   : > { %v2652_v7 = vrot.slane %v866_v55, %v873_v51  ;;  %v868_v44 = vpop.f32.mrb[33].mxu0 }
 0x234   : > { %v2659_v56 = vrot.slane %v868_v44, %v873_v51 }
 0x235   : > { %v2665_v55 = vadd.f32 %v2652_v7, %v798_v40  ;;  %v2668_v49 = vadd.f32 %v2652_v7, %v796_v58  ;;  %v881_v60 = vadd.f32 %v2652_v7, %v2510_v30  ;;  %v879_v42 = vadd.f32 %v2652_v7, %v2506_v28 }
 0x236   : > { %v2681_v44 = vadd.f32 %v2659_v56, %v798_v40  ;;  %v2684_v3 = vadd.f32 %v2659_v56, %v796_v58  ;;  %v882_v2 = vadd.f32 %v2659_v56, %v2510_v30  ;;  %v880_v62 = vadd.f32 %v2659_v56, %v2506_v28 }
 0x237   : > { %v2697_v63 = vmul.f32 0.2, %v2665_v55  ;;  %v2700_v40 = vmul.f32 0.2, %v2668_v49  ;;  %vm913_vm6 = vcmp.gt.f32.partialorder %v881_v60, 0.0  ;;  %vm911_vm7 = vcmp.gt.f32.partialorder %v879_v42, 0.0 }
 0x238   : > { %v2715_v52 = vmul.f32 0.2, %v2681_v44  ;;  %v2718_v0 = vmul.f32 0.2, %v2684_v3  ;;  %vm914_vm10 = vcmp.gt.f32.partialorder %v882_v2, 0.0  ;;  %vm912_vm11 = vcmp.gt.f32.partialorder %v880_v62, 0.0 }
 0x239   : > { %v945_v58 = vmul.f32 0.2, %v881_v60  ;;  %v946_v15 = vmul.f32 0.2, %v882_v2  ;;  %v943_v1 = vmul.f32 0.2, %v879_v42  ;;  %v885_v47 = vadd.f32 %v2652_v7, %v2508_v29 }
 0x23a   : > { %v944_v46 = vmul.f32 0.2, %v880_v62  ;;  %v886_v53 = vadd.f32 %v2659_v56, %v2508_v29  ;;  %v883_v4 = vadd.f32 %v2652_v7, %v2504_v27  ;;  %v884_v35 = vadd.f32 %v2659_v56, %v2504_v27 }
 0x23b   : > { %v977_v8 = vsel %vm913_vm6, %v881_v60, %v945_v58  ;;  %v978_v24 = vsel %vm914_vm10, %v882_v2, %v946_v15  ;;  %v975_v23 = vsel %vm911_vm7, %v879_v42, %v943_v1  ;;  %vm917_vm12 = vcmp.gt.f32.partialorder %v885_v47, 0.0 }
 0x23c   : > { %v2744_v27 = vsel %vm2623_vm0, %v977_v8, -1e+30  ;;  %v2748_v2 = vsel %vm2627_vm1, %v978_v24, -1e+30  ;;  %v976_v60 = vsel %vm912_vm11, %v880_v62, %v944_v46  ;;  %v2753_v5 = vsel %vm2631_vm2, %v975_v23, -1e+30 }
 0x23d   : > { %v1154_v12 = vmax.f32 %v2744_v27, %v2748_v2  ;;  %v2765_v8 = vsel %vm2642_vm3, %v976_v60, -1e+30  ;;  %vm918_vm0 = vcmp.gt.f32.partialorder %v886_v53, 0.0  ;;  %v949_v24 = vmul.f32 0.2, %v885_v47 }
 0x23e   : > { %vm2769_vm1 = vcmp.ne.s32.totalorder %v1064_v14, 0  ;;  %v1151_v13 = vmax.f32 %v2753_v5, %v2765_v8  ;;  %v950_v41 = vmul.f32 0.2, %v886_v53  ;;  %vm915_vm2 = vcmp.gt.f32.partialorder %v883_v4, 0.0 }
 0x23f   : > { %vm916_vm6 = vcmp.gt.f32.partialorder %v884_v35, 0.0  ;;  %1155 = vmax.xlane.f32.xlu1 %v1154_v12  ;;  %v981_v43 = vsel %vm917_vm12, %v885_v47, %v949_v24  ;;  %v947_v45 = vmul.f32 0.2, %v883_v4  ;;  %v948_v46 = vmul.f32 0.2, %v884_v35 }
 0x240   : > { %v889_v59 = vadd.f32 %v2652_v7, %v2512_v31  ;;  %1152 = vmax.xlane.f32.xlu0 %v1151_v13  ;;  %v982_v61 = vsel %vm918_vm0, %v886_v53, %v950_v41  ;;  %v2780_v14 = vsel %vm2676_vm4, %v981_v43, -1e+30  ;;  %v890_v62 = vadd.f32 %v2659_v56, %v2512_v31 }
 0x241   : > { %v887_v15 = vadd.f32 %v2652_v7, %v2514_v32  ;;  %vm2788_vm3 = vcmp.ne.s32.totalorder %v1069_v18, 0  ;;  %vm2794_vm7 = vcmp.ne.s32.totalorder %v1070_v20, 0  ;;  %v2800_v51 = vsel %vm2692_vm5, %v982_v61, -1e+30 }
 0x242   : > { %v979_v31 = vsel %vm915_vm2, %v883_v4, %v947_v45  ;;  %v980_v58 = vsel %vm916_vm6, %v884_v35, %v948_v46  ;;  %vm921_vm4 = vcmp.gt.f32.partialorder %v889_v59, 0.0  ;;  %v1160_v1 = vmax.f32 %v2780_v14, %v2800_v51 }
 0x243   : > { %v2806_v18 = vsel %vm2704_vm8, %v979_v31, -1e+30  ;;  %v2810_v6 = vsel %vm2710_vm9, %v980_v58, -1e+30  ;;  %vm922_vm10 = vcmp.gt.f32.partialorder %v890_v62, 0.0  ;;  %v3220_v20 = vunpack.c.l.b16 %v2588_v9 }
 0x244   : > { %v1157_v35 = vmax.f32 %v2806_v18, %v2810_v6  ;;  %v953_v53 = vmul.f32 0.2, %v889_v59  ;;  %v954_v4 = vmul.f32 0.2, %v890_v62  ;;  %v888_v30 = vadd.f32 %v2659_v56, %v2514_v32  ;;  %1161 = vmax.xlane.f32.xlu1 %v1160_v1 }
 0x245   : > { %vm2814_vm11 = vcmp.ne.s32.totalorder %v3220_v20, 0  ;;  %vm919_vm5 = vcmp.gt.f32.partialorder %v887_v15, 0.0  ;;  %v951_v28 = vmul.f32 0.2, %v887_v15  ;;  %v893_v60 = vadd.f32 %v2652_v7, %v2516_v33 }
 0x246   : > { %v894_v12 = vadd.f32 %v2659_v56, %v2516_v33  ;;  %v3223_v24 = vunpack.c.h.b16 %v2588_v9  ;;  %1158 = vmax.xlane.f32.xlu0 %v1157_v35  ;;  %v985_v41 = vsel %vm921_vm4, %v889_v59, %v953_v53  ;;  %v986_v43 = vsel %vm922_vm10, %v890_v62, %v954_v4 }
 0x247   : > { %vm920_vm9 = vcmp.gt.f32.partialorder %v888_v30, 0.0  ;;  %v952_v32 = vmul.f32 0.2, %v888_v30  ;;  %v3226_v45 = vunpack.c.l.b16 %v2596_v17  ;;  %v3229_v33 = vunpack.c.h.b16 %v2596_v17 }
 0x248   : > { %vm2828_vm8 = vcmp.ne.s32.totalorder %v3223_v24, 0  ;;  %v2847_v61 = vsel %vm2732_vm13, %v985_v41, -1e+30  ;;  %v2851_v59 = vsel %vm2738_vm14, %v986_v43, -1e+30  ;;  %v983_v62 = vsel %vm919_vm5, %v887_v15, %v951_v28 }
 0x249   : > { %vm2835_vm12 = vcmp.ne.s32.totalorder %v3226_v45, 0  ;;  %vm2841_vm0 = vcmp.ne.s32.totalorder %v3229_v33, 0  ;;  %vm925_vm2 = vcmp.gt.f32.partialorder %v893_v60, 0.0  ;;  %v1166_v31 = vmax.f32 %v2847_v61, %v2851_v59 }
 0x24a   : > { %v984_v58 = vsel %vm920_vm9, %v888_v30, %v952_v32  ;;  %v2857_v17 = vsel %vm2757_vm15, %v983_v62, -1e+30  ;;  %vm926_vm6 = vcmp.gt.f32.partialorder %v894_v12, 0.0  ;;  %v957_v1 = vmul.f32 0.2, %v893_v60 }
 0x24b   : > { %v2861_v21 = vsel %vm2769_vm1, %v984_v58, -1e+30  ;;  %v958_v20 = vmul.f32 0.2, %v894_v12  ;;  %v891_v29 = vadd.f32 %v2652_v7, %v2518_v34  ;;  %1167 = vmax.xlane.f32.xlu1 %v1166_v31  ;;  %v892_v35 = vadd.f32 %v2659_v56, %v2518_v34 }
 0x24c   : > { %v1163_v15 = vmax.f32 %v2857_v17, %v2861_v21  ;;  %v897_v57 = vadd.f32 %v2652_v7, %v2528_v37  ;;  %v898_v23 = vadd.f32 %v2659_v56, %v2528_v37  ;;  %v3232_v53 = vunpack.c.l.b16 %v2600_v19 }
 0x24d   : > { %v3235_v30 = vunpack.c.h.b16 %v2600_v19  ;;  %v989_v34 = vsel %vm925_vm2, %v893_v60, %v957_v1  ;;  %v990_v24 = vsel %vm926_vm6, %v894_v12, %v958_v20  ;;  %vm923_vm15 = vcmp.gt.f32.partialorder %v891_v29, 0.0 }
 0x24e   : > { %vm2875_vm13 = vcmp.ne.s32.totalorder %v3232_v53, 0  ;;  %v955_v41 = vmul.f32 0.2, %v891_v29  ;;  %v3238_v43 = vunpack.c.l.b16 %v2605_v22  ;;  %v3241_v32 = vunpack.c.h.b16 %v2605_v22  ;;  %1164 = vmax.xlane.f32.xlu0 %v1163_v15 }
 0x24f   : > { %vm2881_vm14 = vcmp.ne.s32.totalorder %v3235_v30, 0  ;;  %v2900_v19 = vsel %vm2788_vm3, %v989_v34, -1e+30  ;;  %v2904_v60 = vsel %vm2794_vm7, %v990_v24, -1e+30  ;;  %vm924_vm10 = vcmp.gt.f32.partialorder %v892_v35, 0.0 }
 0x250   : > { %vm2888_vm1 = vcmp.ne.s32.totalorder %v3238_v43, 0  ;;  %vm2894_vm4 = vcmp.ne.s32.totalorder %v3241_v32, 0  ;;  %vm929_vm5 = vcmp.gt.f32.partialorder %v897_v57, 0.0  ;;  %v1172_v12 = vmax.f32 %v2900_v19, %v2904_v60 }
 0x251   : > { %v956_v33 = vmul.f32 0.2, %v892_v35  ;;  %v987_v22 = vsel %vm923_vm15, %v891_v29, %v955_v41  ;;  %vm930_vm9 = vcmp.gt.f32.partialorder %v898_v23, 0.0  ;;  %v961_v31 = vmul.f32 0.2, %v897_v57 }
 0x252   : > { %v2910_v62 = vsel %vm2814_vm11, %v987_v22, -1e+30  ;;  %v962_v47 = vmul.f32 0.2, %v898_v23  ;;  %v895_v58 = vadd.f32 %v2652_v7, %v2530_v38  ;;  %1173 = vmax.xlane.f32.xlu1 %v1172_v12  ;;  %v896_v1 = vadd.f32 %v2659_v56, %v2530_v38 }
 0x253   : > { %v988_v42 = vsel %vm924_vm10, %v892_v35, %v956_v33  ;;  %v901_v20 = vadd.f32 %v2652_v7, %v2545_v48  ;;  %v902_v29 = vadd.f32 %v2659_v56, %v2545_v48  ;;  %vm2922_vm3 = vcmp.ne.s32.totalorder %v3244_v10, 0 }
 0x254   : > { %v3247_v53 = vunpack.c.h.b16 %v2610_v25  ;;  %v2934_v38 = vsel %vm2828_vm8, %v988_v42, -1e+30  ;;  %v993_v35 = vsel %vm929_vm5, %v897_v57, %v961_v31  ;;  %v994_v34 = vsel %vm930_vm9, %v898_v23, %v962_v47 }
 0x255   : > { %vm927_vm11 = vcmp.gt.f32.partialorder %v895_v58, 0.0  ;;  %v3250_v48 = vunpack.c.l.b16 %v2613_v26  ;;  %v1169_v25 = vmax.f32 %v2910_v62, %v2934_v38  ;;  %v2947_v41 = vsel %vm2835_vm12, %v993_v35, -1e+30 }
 0x256   : > { %vm2928_vm7 = vcmp.ne.s32.totalorder %v3247_v53, 0  ;;  %v2951_v13 = vsel %vm2841_vm0, %v994_v34, -1e+30  ;;  %vm928_vm8 = vcmp.gt.f32.partialorder %v896_v1, 0.0  ;;  %v959_v23 = vmul.f32 0.2, %v895_v58 }
 0x257   : > { %vm2939_vm2 = vcmp.ne.s32.totalorder %v3250_v48, 0  ;;  %v1178_v57 = vmax.f32 %v2947_v41, %v2951_v13  ;;  %v960_v43 = vmul.f32 0.2, %v896_v1  ;;  %vm933_vm6 = vcmp.gt.f32.partialorder %v901_v20, 0.0  ;;  %1170 = vmax.xlane.f32.xlu0 %v1169_v25 }
 0x258   : > { %vm934_vm15 = vcmp.gt.f32.partialorder %v902_v29, 0.0  ;;  %v965_v32 = vmul.f32 0.2, %v901_v20  ;;  %v966_v12 = vmul.f32 0.2, %v902_v29  ;;  %v899_v46 = vadd.f32 %v2652_v7, %v2548_v50 }
 0x259   : > { %v3253_v33 = vunpack.c.h.b16 %v2613_v26  ;;  %v3256_v22 = vunpack.c.l.b16 %v2621_v39  ;;  %1179 = vmax.xlane.f32.xlu1 %v1178_v57  ;;  %v991_v47 = vsel %vm927_vm11, %v895_v58, %v959_v23  ;;  %v992_v42 = vsel %vm928_vm8, %v896_v1, %v960_v43 }
 0x25a   : > { %v900_v10 = vadd.f32 %v2659_v56, %v2548_v50  ;;  %v905_v26 = vadd.f32 %v2652_v7, %v2582_v11  ;;  %v3259_v53 = vunpack.c.l.b16 %v2618_v36  ;;  %v3262_v34 = vunpack.c.h.b16 %v2618_v36 }
 0x25b   : > { %vm2959_vm12 = vcmp.ne.s32.totalorder %v3253_v33, 0  ;;  %vm2965_vm0 = vcmp.ne.s32.totalorder %v3256_v22, 0  ;;  %v3265_v58 = vunpack.c.h.b16 %v2621_v39  ;;  %v2994_v50 = vsel %vm2875_vm13, %v991_v47, -1e+30 }
 0x25c   : > { %vm2976_vm10 = vcmp.ne.s32.totalorder %v3259_v53, 0  ;;  %vm2982_vm5 = vcmp.ne.s32.totalorder %v3262_v34, 0  ;;  %v2998_v25 = vsel %vm2881_vm14, %v992_v42, -1e+30  ;;  %v997_v36 = vsel %vm933_vm6, %v901_v20, %v965_v32 }
 0x25d   : > { %vm2988_vm9 = vcmp.ne.s32.totalorder %v3265_v58, 0  ;;  %v998_v57 = vsel %vm934_vm15, %v902_v29, %v966_v12  ;;  %v1175_v23 = vmax.f32 %v2994_v50, %v2998_v25  ;;  %v3006_v39 = vsel %vm2888_vm1, %v997_v36, -1e+30 }
 0x25e   : > { %v3010_v4 = vsel %vm2894_vm4, %v998_v57, -1e+30  ;;  %vm931_vm13 = vcmp.gt.f32.partialorder %v899_v46, 0.0  ;;  %v3268_v28 = vunpack.c.l.b16 %v2640_v54  ;;  %vm932_vm11 = vcmp.gt.f32.partialorder %v900_v10, 0.0 }
 0x25f   : > { %v1184_v20 = vmax.f32 %v3006_v39, %v3010_v4  ;;  %v963_v29 = vmul.f32 0.2, %v899_v46  ;;  %v964_v32 = vmul.f32 0.2, %v900_v10  ;;  %v3271_v37 = vunpack.c.h.b16 %v2640_v54  ;;  %1176 = vmax.xlane.f32.xlu0 %v1175_v23 }
 0x260   : > { %vm3014_vm14 = vcmp.ne.s32.totalorder %v3268_v28, 0  ;;  %v906_v45 = vadd.f32 %v2659_v56, %v2582_v11  ;;  %vm937_vm4 = vcmp.gt.f32.partialorder %v905_v26, 0.0  ;;  %v969_v33 = vmul.f32 0.2, %v905_v26 }
 0x261   : > { %vm3022_vm1 = vcmp.ne.s32.totalorder %v3271_v37, 0  ;;  %v903_v22 = vadd.f32 %v2652_v7, %v2591_v16  ;;  %1185 = vmax.xlane.f32.xlu1 %v1184_v20  ;;  %v995_v47 = vsel %vm931_vm13, %v899_v46, %v963_v29  ;;  %v996_v42 = vsel %vm932_vm11, %v900_v10, %v964_v32 }
 0x262   : > { %v904_v53 = vadd.f32 %v2659_v56, %v2591_v16  ;;  %vm941_vm8 = vcmp.gt.f32.partialorder %v2665_v55, 0.0  ;;  %v3035_v54 = vsel %vm2922_vm3, %v995_v47, -1e+30  ;;  %v3039_v11 = vsel %vm2928_vm7, %v996_v42, -1e+30 }
 0x263   : > { %vm938_vm6 = vcmp.gt.f32.partialorder %v906_v45, 0.0  ;;  %v1001_v34 = vsel %vm937_vm4, %v905_v26, %v969_v33  ;;  %v1181_v7 = vmax.f32 %v3035_v54, %v3039_v11  ;;  %v970_v46 = vmul.f32 0.2, %v906_v45 }
 0x264   : > { %v3045_v10 = vsel %vm2939_vm2, %v1001_v34, -1e+30  ;;  %vm935_vm15 = vcmp.gt.f32.partialorder %v903_v22, 0.0  ;;  %vm936_vm13 = vcmp.gt.f32.partialorder %v904_v53, 0.0  ;;  %v967_v16 = vmul.f32 0.2, %v903_v22 }
 0x265   : > { %v968_v56 = vmul.f32 0.2, %v904_v53  ;;  %vm942_vm3 = vcmp.gt.f32.partialorder %v2681_v44, 0.0  ;;  %1182 = vmax.xlane.f32.xlu0 %v1181_v7  ;;  %v1002_v15 = vsel %vm938_vm6, %v906_v45, %v970_v46  ;;  %v1005_v30 = vsel %vm941_vm8, %v2665_v55, %v2697_v63 }
 0x266   : > { %v1006_v26 = vsel %vm942_vm3, %v2681_v44, %v2715_v52  ;;  %vm939_vm7 = vcmp.gt.f32.partialorder %v2668_v49, 0.0  ;;  %v3055_v24 = vsel %vm2959_vm12, %v1002_v15, -1e+30  ;;  %v999_v58 = vsel %vm935_vm15, %v903_v22, %v967_v16 }
 0x267   : > { %v1000_v36 = vsel %vm936_vm13, %v904_v53, %v968_v56  ;;  %v3059_v57 = vsel %vm2965_vm0, %v1005_v30, -1e+30  ;;  %v1190_v23 = vmax.f32 %v3045_v10, %v3055_v24  ;;  %v3065_v55 = vsel %vm2976_vm10, %v999_v58, -1e+30 }
 0x268   : > { %v3069_v44 = vsel %vm2982_vm5, %v1000_v36, -1e+30  ;;  %v3073_v63 = vsel %vm2988_vm9, %v1006_v26, -1e+30  ;;  %vm940_vm2 = vcmp.gt.f32.partialorder %v2684_v3, 0.0  ;;  %v1003_v9 = vsel %vm939_vm7, %v2668_v49, %v2700_v40 }
 0x269   : > { %v1187_v52 = vmax.f32 %v3065_v55, %v3069_v44  ;;  %1191 = vmax.xlane.f32.xlu1 %v1190_v23  ;;  %v1004_v31 = vsel %vm940_vm2, %v2684_v3, %v2718_v0  ;;  %v3084_v35 = vsel %vm3014_vm14, %v1003_v9, -1e+30  ;;  %v1196_v1 = vmax.f32 %v3059_v57, %v3073_v63 }
 0x26a   : > { %v3088_v48 = vsel %vm3022_vm1, %v1004_v31, -1e+30 }
 0x26b   : > { %1188 = vmax.xlane.f32.xlu0 %v1187_v52  ;;  %v1193_v28 = vmax.f32 %v3084_v35, %v3088_v48 }
 0x26d   : > { %1197 = vmax.xlane.f32.xlu1 %v1196_v1 }
 0x26f   : > { %1194 = vmax.xlane.f32.xlu0 %v1193_v28 }
 0x2cc   : > { %v1156_v49 = vpop.xlane.xlu1 %1155 }
 0x2cd   : > { %v1201_v3 = vsub.f32 %v2744_v27, %v1156_v49  ;;  %v1202_v40 = vsub.f32 %v2748_v2, %v1156_v49  ;;  %v1153_v0 = vpop.xlane.xlu0 %1152 }
 0x2ce   : > { %v1199_v43 = vsub.f32 %v2753_v5, %v1153_v0  ;;  %v1200_v20 = vsub.f32 %v2765_v8, %v1153_v0 }
 0x2cf   : > { %v1235_v29 = vmul.f32 1.442695, %v1201_v3  ;;  %v1237_v32 = vmul.f32 1.442695, %v1202_v40 }
 0x2d0   : > { %v1231_v37 = vmul.f32 1.442695, %v1199_v43  ;;  %v1233_v12 = vmul.f32 1.442695, %v1200_v20 }
 0x2d1   : > { %2127 = vpow2.f32 %v1235_v29  ;;  %v1162_v45 = vpop.xlane.xlu1 %1161 }
 0x2d2   : > { %2129 = vpow2.f32 %v1237_v32  ;;  %v1205_v33 = vsub.f32 %v2780_v14, %v1162_v45  ;;  %v1206_v22 = vsub.f32 %v2800_v51, %v1162_v45 }
 0x2d3   : > { %v1159_v47 = vpop.xlane.xlu0 %1158  ;;  %2131 = vpow2.f32 %v1231_v37 }
 0x2d4   : > { %v1203_v27 = vsub.f32 %v2806_v18, %v1159_v47  ;;  %v1204_v2 = vsub.f32 %v2810_v6, %v1159_v47  ;;  %2133 = vpow2.f32 %v1233_v12  ;;  %v1243_v5 = vmul.f32 1.442695, %v1205_v33 }
 0x2d5   : > { %v1245_v8 = vmul.f32 1.442695, %v1206_v22 }
 0x2d6   : > { %v1239_v42 = vmul.f32 1.442695, %v1203_v27  ;;  %v1241_v53 = vmul.f32 1.442695, %v1204_v2  ;;  %2135 = vpow2.f32 %v1243_v5 }
 0x2d7   : > { %2137 = vpow2.f32 %v1245_v8 }
 0x2d8   : > { %v1168_v34 = vpop.xlane.xlu1 %1167  ;;  %2139 = vpow2.f32 %v1239_v42 }
 0x2d9   : > { %v1209_v7 = vsub.f32 %v2847_v61, %v1168_v34  ;;  %v1210_v14 = vsub.f32 %v2851_v59, %v1168_v34  ;;  %2141 = vpow2.f32 %v1241_v53 }
 0x2db   : > { %v1165_v51 = vpop.xlane.xlu0 %1164  ;;  %v1251_v46 = vmul.f32 1.442695, %v1209_v7  ;;  %v1253_v16 = vmul.f32 1.442695, %v1210_v14  ;;  %v2128_v56 = vpop.eup %2127 }
 0x2dc   : > { %v1207_v18 = vsub.f32 %v2857_v17, %v1165_v51  ;;  %v1208_v6 = vsub.f32 %v2861_v21, %v1165_v51  ;;  %v2130_v26 = vpop.eup %2129 }
 0x2dd   : > { %2143 = vpow2.f32 %v1251_v46  ;;  %v2132_v36 = vpop.eup %2131  ;;  %v1298_v23 = vadd.f32 %v2130_v26, %v2128_v56 }
 0x2de   : > { %v1247_v15 = vmul.f32 1.442695, %v1207_v18  ;;  %2145 = vpow2.f32 %v1253_v16  ;;  %v1249_v58 = vmul.f32 1.442695, %v1208_v6  ;;  %v2134_v52 = vpop.eup %2133 }
 0x2df   : > { %v1174_v30 = vpop.xlane.xlu1 %1173  ;;  %1407 = vmatprep.mubr.f32.mxu1 %v2134_v52  ;;  %1299 = vadd.xlane.f32.xlu1 %v1298_v23  ;;  %v1295_v21 = vadd.f32 %v2134_v52, %v2132_v36 }
 0x2e0   : > { %v1213_v61 = vsub.f32 %v2900_v19, %v1174_v30  ;;  %v1214_v59 = vsub.f32 %v2904_v60, %v1174_v30  ;;  %2147 = vpow2.f32 %v1247_v15  ;;  %v2136_v1 = vpop.eup %2135  ;;  %1408 = vmatmul.mubr.f32.vlgmr.msra.gmra.mrb[16].mxu1 %v2132_v36 }
 0x2e1   : > { %2149 = vpow2.f32 %v1249_v58  ;;  %v2138_v60 = vpop.eup %2137  ;;  %1412 = vmatprep.mubr.f32.mxu1 %v2130_v26  ;;  %1296 = vadd.xlane.f32.xlu0 %v1295_v21 }
 0x2e2   : > { %v1259_v9 = vmul.f32 1.442695, %v1213_v61  ;;  %v1261_v17 = vmul.f32 1.442695, %v1214_v59  ;;  %v2140_v0 = vpop.eup %2139  ;;  %v1304_v29 = vadd.f32 %v2138_v60, %v2136_v1 }
 0x2e3   : > { %v2142_v32 = vpop.eup %2141 }
 0x2e4   : > { %v1171_v31 = vpop.xlane.xlu0 %1170  ;;  %2151 = vpow2.f32 %v1259_v9  ;;  %1413 = vmatmul.mubr.f32.gmra.mrb[18].mxu1 %v2128_v56  ;;  %1305 = vadd.xlane.f32.xlu1 %v1304_v29 }
 0x2e5   : > { %v1211_v28 = vsub.f32 %v2910_v62, %v1171_v31  ;;  %v1212_v49 = vsub.f32 %v2934_v38, %v1171_v31  ;;  %2153 = vpow2.f32 %v1261_v17  ;;  %v1301_v38 = vadd.f32 %v2142_v32, %v2140_v0  ;;  %1417 = vmatprep.mubr.f32.mxu1 %v2142_v32 }
 0x2e6   : > { %v1180_v19 = vpop.xlane.xlu1 %1179 }
 0x2e7   : > { %v1217_v3 = vsub.f32 %v2947_v41, %v1180_v19  ;;  %v1218_v40 = vsub.f32 %v2951_v13, %v1180_v19  ;;  %v1255_v43 = vmul.f32 1.442695, %v1211_v28  ;;  %v1257_v20 = vmul.f32 1.442695, %v1212_v49  ;;  %v3112_v45 = vpop.eup %2143  ;;  %1302 = vadd.xlane.f32.xlu0 %v1301_v38 }
 0x2e8   : > { %v2146_v22 = vpop.eup %2145  ;;  %1418 = vmatmul.mubr.f32.gmra.mrb[20].mxu1 %v2140_v0 }
 0x2e9   : > { %v1267_v37 = vmul.f32 1.442695, %v1217_v3  ;;  %v1269_v12 = vmul.f32 1.442695, %v1218_v40  ;;  %2155 = vpow2.f32 %v1255_v43  ;;  %v1310_v42 = vadd.f32 %v2146_v22, %v3112_v45  ;;  %1422 = vmatprep.mubr.f32.mxu1 %v2138_v60 }
 0x2ea   : > { %2157 = vpow2.f32 %v1257_v20  ;;  %v2148_v2 = vpop.eup %2147 }
 0x2eb   : > { %2159 = vpow2.f32 %v1267_v37  ;;  %v2150_v53 = vpop.eup %2149  ;;  %1311 = vadd.xlane.f32.xlu1 %v1310_v42 }
 0x2ec   : > { %v1177_v62 = vpop.xlane.xlu0 %1176  ;;  %2161 = vpow2.f32 %v1269_v12  ;;  %v1307_v7 = vadd.f32 %v2150_v53, %v2148_v2  ;;  %1423 = vmatmul.mubr.f32.gmra.mrb[22].mxu1 %v2136_v1 }
 0x2ed   : > { %v1215_v41 = vsub.f32 %v2994_v50, %v1177_v62  ;;  %v1216_v13 = vsub.f32 %v2998_v25, %v1177_v62  ;;  %1427 = vmatprep.mubr.f32.mxu1 %v2150_v53 }
 0x2ee   : > { %v1186_v33 = vpop.xlane.xlu1 %1185  ;;  %v3119_v14 = vpop.eup %2151  ;;  %1308 = vadd.xlane.f32.xlu0 %v1307_v7 }
 0x2ef   : > { %v1221_v47 = vsub.f32 %v3006_v39, %v1186_v33  ;;  %v1222_v27 = vsub.f32 %v3010_v4, %v1186_v33  ;;  %v1263_v5 = vmul.f32 1.442695, %v1215_v41  ;;  %v1265_v8 = vmul.f32 1.442695, %v1216_v13  ;;  %v2154_v51 = vpop.eup %2153 }
 0x2f0   : > { %v1316_v18 = vadd.f32 %v2154_v51, %v3119_v14  ;;  %1428 = vmatmul.mubr.f32.gmra.mrb[24].mxu1 %v2148_v2 }
 0x2f1   : > { %v1275_v34 = vmul.f32 1.442695, %v1221_v47  ;;  %v1277_v50 = vmul.f32 1.442695, %v1222_v27  ;;  %2163 = vpow2.f32 %v1263_v5  ;;  %1432 = vmatprep.mubr.f32.mxu1 %v2146_v22 }
 0x2f2   : > { %v1183_v25 = vpop.xlane.xlu0 %1182  ;;  %2165 = vpow2.f32 %v1265_v8  ;;  %1317 = vadd.xlane.f32.xlu1 %v1316_v18 }
 0x2f3   : > { %v1219_v39 = vsub.f32 %v3035_v54, %v1183_v25  ;;  %v1220_v4 = vsub.f32 %v3039_v11, %v1183_v25  ;;  %2167 = vpow2.f32 %v1275_v34  ;;  %v2156_v56 = vpop.eup %2155  ;;  %v3141_v25 = vld [vmem:[%s3190_s6] ss:$0 sm:$0xff] }
 0x2f4   : > { %2169 = vpow2.f32 %v1277_v50  ;;  %v2158_v11 = vpop.eup %2157  ;;  %1433 = vmatmul.mubr.f32.gmra.mrb[26].mxu1 %v3112_v45 }
 0x2f5   : > { %v1271_v46 = vmul.f32 1.442695, %v1219_v39  ;;  %v1273_v16 = vmul.f32 1.442695, %v1220_v4  ;;  %v3128_v61 = vpop.eup %2159  ;;  %v1313_v23 = vadd.f32 %v2158_v11, %v2156_v56  ;;  %1437 = vmatprep.mubr.f32.mxu1 %v2158_v11 }
 0x2f6   : > { %v1192_v6 = vpop.xlane.xlu1 %1191  ;;  %v2162_v52 = vpop.eup %2161 }
 0x2f7   : > { %2171 = vpow2.f32 %v1271_v46  ;;  %v1225_v15 = vsub.f32 %v3045_v10, %v1192_v6  ;;  %v1226_v30 = vsub.f32 %v3055_v24, %v1192_v6  ;;  %1314 = vadd.xlane.f32.xlu0 %v1313_v23 }
 0x2f8   : > { %v1189_v54 = vpop.xlane.xlu0 %1188  ;;  %2173 = vpow2.f32 %v1273_v16  ;;  %1438 = vmatmul.mubr.f32.gmra.mrb[28].mxu1 %v2156_v56 }
 0x2f9   : > { %v1223_v26 = vsub.f32 %v3065_v55, %v1189_v54  ;;  %v1224_v58 = vsub.f32 %v3069_v44, %v1189_v54  ;;  %v1283_v59 = vmul.f32 1.442695, %v1225_v15  ;;  %v1285_v36 = vmul.f32 1.442695, %v1226_v30  ;;  %1442 = vmatprep.mubr.f32.mxu1 %v2154_v51 }
 0x2fa   : > { %v1198_v10 = vpop.xlane.xlu1 %1197  ;;  %v1322_v55 = vadd.f32 %v2162_v52, %v3128_v61 }
 0x2fb   : > { %v1279_v9 = vmul.f32 1.442695, %v1223_v26  ;;  %v1281_v17 = vmul.f32 1.442695, %v1224_v58  ;;  %2175 = vpow2.f32 %v1283_v59  ;;  %v1229_v24 = vsub.f32 %v3059_v57, %v1198_v10  ;;  %v2164_v44 = vpop.eup %2163 }
 0x2fc   : > { %v1230_v31 = vsub.f32 %v3073_v63, %v1198_v10  ;;  %v1195_v21 = vpop.xlane.xlu0 %1194  ;;  %2177 = vpow2.f32 %v1285_v36  ;;  %v2166_v49 = vpop.eup %2165  ;;  %1323 = vadd.xlane.f32.xlu1 %v1322_v55  ;;  %1443 = vmatmul.mubr.f32.gmra.mrb[30].mxu1 %v3119_v14 }
 0x2fd   : > { %v1227_v1 = vsub.f32 %v3084_v35, %v1195_v21  ;;  %v1228_v28 = vsub.f32 %v3088_v48, %v1195_v21  ;;  %2179 = vpow2.f32 %v1279_v9  ;;  %v1291_v19 = vmul.f32 1.442695, %v1229_v24  ;;  %v2168_v57 = vpop.eup %2167  ;;  %1447 = vmatprep.mubr.f32.mxu1 %v2166_v49 }
 0x2fe   : > { %v1293_v60 = vmul.f32 1.442695, %v1230_v31  ;;  %2181 = vpow2.f32 %v1281_v17  ;;  %v1319_v40 = vadd.f32 %v2166_v49, %v2164_v44  ;;  %v2170_v0 = vpop.eup %2169 }
 0x2ff   : > { %v1287_v63 = vmul.f32 1.442695, %v1227_v1  ;;  %v1289_v3 = vmul.f32 1.442695, %v1228_v28  ;;  %2183 = vpow2.f32 %v1291_v19  ;;  %v1328_v35 = vadd.f32 %v2170_v0, %v2168_v57 }
 0x300   : > { %2185 = vpow2.f32 %v1293_v60  ;;  %1320 = vadd.xlane.f32.xlu0 %v1319_v40  ;;  %1448 = vmatmul.mubr.f32.gmra.mrb[32].mxu1 %v2164_v44 }
 0x301   : > { %v2172_v43 = vpop.eup %2171  ;;  %2187 = vpow2.f32 %v1287_v63  ;;  %1329 = vadd.xlane.f32.xlu1 %v1328_v35  ;;  %1452 = vmatprep.mubr.f32.mxu1 %v2162_v52 }
 0x302   : > { %v2174_v48 = vpop.eup %2173  ;;  %2189 = vpow2.f32 %v1289_v3 }
 0x303   : > { %v1325_v20 = vadd.f32 %v2174_v48, %v2172_v43 }
 0x304   : > { %1453 = vmatmul.mubr.f32.gmra.mrb[34].mxu1 %v3128_v61 }
 0x305   : > { %v2176_v29 = vpop.eup %2175  ;;  %1326 = vadd.xlane.f32.xlu0 %v1325_v20  ;;  %1457 = vmatprep.mubr.f32.mxu1 %v2174_v48 }
 0x306   : > { %v2178_v32 = vpop.eup %2177 }
 0x307   : > { %v2180_v37 = vpop.eup %2179  ;;  %v1334_v12 = vadd.f32 %v2178_v32, %v2176_v29 }
 0x308   : > { %v2182_v62 = vpop.eup %2181  ;;  %1458 = vmatmul.mubr.f32.gmra.mrb[36].mxu1 %v2172_v43 }
 0x309   : > { %v2184_v38 = vpop.eup %2183  ;;  %1335 = vadd.xlane.f32.xlu1 %v1334_v12  ;;  %v1331_v45 = vadd.f32 %v2182_v62, %v2180_v37  ;;  %1462 = vmatprep.mubr.f32.mxu1 %v2170_v0 }
 0x30a   : > { %v2186_v41 = vpop.eup %2185 }
 0x30b   : > { %v2188_v13 = vpop.eup %2187  ;;  %1332 = vadd.xlane.f32.xlu0 %v1331_v45  ;;  %v1340_v33 = vadd.f32 %v2186_v41, %v2184_v38 }
 0x30c   : > { %v2190_v22 = vpop.eup %2189  ;;  %1463 = vmatmul.mubr.f32.gmra.mrb[38].mxu1 %v2168_v57 }
 0x30d   : > { %1341 = vadd.xlane.f32.xlu1 %v1340_v33  ;;  %v1337_v47 = vadd.f32 %v2190_v22, %v2188_v13  ;;  %1467 = vmatprep.mubr.f32.mxu1 %v2182_v62 }
 0x30f   : > { %1338 = vadd.xlane.f32.xlu0 %v1337_v47 }
 0x310   : > { %1468 = vmatmul.mubr.f32.gmra.mrb[40].mxu1 %v2180_v37 }
 0x311   : > { %1472 = vmatprep.mubr.f32.mxu1 %v2178_v32 }
 0x314   : > { %1473 = vmatmul.mubr.f32.gmra.mrb[42].mxu1 %v2176_v29 }
 0x315   : > { %1477 = vmatprep.mubr.f32.mxu1 %v2190_v22 }
 0x318   : > { %1478 = vmatmul.mubr.f32.gmra.mrb[44].mxu1 %v2188_v13 }
 0x319   : > { %1482 = vmatprep.mubr.f32.mxu1 %v2186_v41 }
 0x31c   : > { %1483 = vmatmul.mubr.f32.gmra.mrb[46].mxu1 %v2184_v38 }
 0x36c   : > { %v1300_v2 = vpop.xlane.xlu1 %1299 }
 0x36e   : > { %v1297_v27 = vpop.xlane.xlu0 %1296 }
 0x36f   : > { %2191 = vrcp.f32 %v1297_v27 }
 0x370   : > { %2193 = vrcp.f32 %v1300_v2 }
 0x371   : > { %v1306_v53 = vpop.xlane.xlu1 %1305 }
 0x374   : > { %v1303_v5 = vpop.xlane.xlu0 %1302 }
 0x375   : > { %2195 = vrcp.f32 %v1303_v5 }
 0x376   : > { %2197 = vrcp.f32 %v1306_v53 }
 0x378   : > { %v1312_v30 = vpop.xlane.xlu1 %1311 }
 0x379   : > { %v2192_v50 = vpop.eup %2191 }
 0x37a   : > { %v2194_v16 = vpop.eup %2193 }
 0x37b   : > { %v1309_v4 = vpop.xlane.xlu0 %1308 }
 0x37c   : > { %2199 = vrcp.f32 %v1309_v4 }
 0x37d   : > { %2201 = vrcp.f32 %v1312_v30 }
 0x37f   : > { %v2196_v26 = vpop.eup %2195  ;;  %v1318_v55 = vpop.xlane.xlu1 %1317 }
 0x380   : > { %v2198_v17 = vpop.eup %2197 }
 0x384   : > { %v1315_v23 = vpop.xlane.xlu0 %1314 }
 0x385   : > { %2203 = vrcp.f32 %v1315_v23 }
 0x386   : > { %v2200_v28 = vpop.eup %2199  ;;  %2205 = vrcp.f32 %v1318_v55 }
 0x387   : > { %v2202_v0 = vpop.eup %2201 }
 0x389   : > { %v1324_v29 = vpop.xlane.xlu1 %1323 }
 0x38d   : > { %v1321_v63 = vpop.xlane.xlu0 %1320 }
 0x38e   : > { %2207 = vrcp.f32 %v1321_v63 }
 0x38f   : > { %v2204_v12 = vpop.eup %2203  ;;  %2209 = vrcp.f32 %v1324_v29 }
 0x390   : > { %v2206_v47 = vpop.eup %2205 }
 0x392   : > { %v1327_v13 = vpop.xlane.xlu0 %1326 }
 0x393   : > { %2211 = vrcp.f32 %v1327_v13 }
 0x3b3   : > { %v1806_v8 = vpop.f32.mrb[16].mxu1 }
 0x3b4   : > { %v1807_v42 = vpop.f32.mrb[17].mxu1 }
 0x3b5   : > { %v1808_v34 = vadd.f32 %v1807_v42, %v1806_v8  ;;  %v1330_v42 = vpop.xlane.xlu1 %1329 }
 0x3b6   : > { %2213 = vrcp.f32 %v1330_v42 }
 0x3b7   : > { %v1504_v7 = vmul.f32 %v2192_v50, %v1808_v34  ;;  %v1809_v14 = vpop.f32.mrb[18].mxu1  ;;  %v2208_v50 = vpop.eup %2207 }
 0x3b8   : > { %v1810_v39 = vpop.f32.mrb[19].mxu1 }
 0x3b9   : > { %v1527_v51 = vadd.f32 %v3141_v25, %v1504_v7  ;;  %v1811_v46 = vadd.f32 %v1810_v39, %v1809_v14 }
 0x3bb   : > { %v1543_v18 = vmax.f32 %v1527_v51, 0.0  ;;  %v1505_v6 = vmul.f32 %v2194_v16, %v1811_v46  ;;  %v1812_v56 = vpop.f32.mrb[20].mxu1  ;;  %v1333_v51 = vpop.xlane.xlu0 %1332 }
 0x3bc   : > { %v1813_v15 = vpop.f32.mrb[21].mxu1  ;;  %2215 = vrcp.f32 %v1333_v51 }
 0x3bd   : > { %1559 = vst [vmem:[%s3148_s12] sm:$0xff] %v1543_v18  ;;  %v1528_v54 = vadd.f32 %v3141_v25, %v1505_v6  ;;  %v1814_v11 = vadd.f32 %v1813_v15, %v1812_v56  ;;  %v2210_v18 = vpop.eup %2209 }
 0x3bf   : > { %v1544_v58 = vmax.f32 %v1528_v54, 0.0  ;;  %v1506_v61 = vmul.f32 %v2196_v26, %v1814_v11  ;;  %v1815_v59 = vpop.f32.mrb[22].mxu1  ;;  %v1336_v54 = vpop.xlane.xlu1 %1335 }
 0x3c0   : > { %v1816_v36 = vpop.f32.mrb[23].mxu1  ;;  %2217 = vrcp.f32 %v1336_v54 }
 0x3c1   : > { %1560 = vst [vmem:[%s3148_s12 + $0x8] sm:$0xff] %v1544_v58  ;;  %v1529_v52 = vadd.f32 %v3141_v25, %v1506_v61  ;;  %v1817_v9 = vadd.f32 %v1816_v36, %v1815_v59  ;;  %v2212_v58 = vpop.eup %2211 }
 0x3c3   : > { %v1545_v10 = vmax.f32 %v1529_v52, 0.0  ;;  %v1507_v24 = vmul.f32 %v2198_v17, %v1817_v9  ;;  %v1818_v31 = vpop.f32.mrb[24].mxu1  ;;  %v1339_v52 = vpop.xlane.xlu0 %1338 }
 0x3c4   : > { %v1819_v21 = vpop.f32.mrb[25].mxu1  ;;  %2219 = vrcp.f32 %v1339_v52 }
 0x3c5   : > { %1561 = vst [vmem:[%s3148_s12 + $0x10] sm:$0xff] %v1545_v10  ;;  %v1530_v44 = vadd.f32 %v3141_v25, %v1507_v24  ;;  %v1820_v1 = vadd.f32 %v1819_v21, %v1818_v31  ;;  %v2214_v10 = vpop.eup %2213 }
 0x3c7   : > { %v1546_v49 = vmax.f32 %v1530_v44, 0.0  ;;  %v1508_v19 = vmul.f32 %v2200_v28, %v1820_v1  ;;  %v1821_v60 = vpop.f32.mrb[26].mxu1  ;;  %v1342_v44 = vpop.xlane.xlu1 %1341 }
 0x3c8   : > { %v1822_v57 = vpop.f32.mrb[27].mxu1  ;;  %2221 = vrcp.f32 %v1342_v44 }
 0x3c9   : > { %1562 = vst [vmem:[%s3148_s12 + $0x18] sm:$0xff] %v1546_v49  ;;  %v1531_v3 = vadd.f32 %v3141_v25, %v1508_v19  ;;  %v1823_v40 = vadd.f32 %v1822_v57, %v1821_v60  ;;  %v2216_v49 = vpop.eup %2215 }
 0x3cb   : > { %v1547_v35 = vmax.f32 %v1531_v3, 0.0  ;;  %v1509_v43 = vmul.f32 %v2202_v0, %v1823_v40  ;;  %v1824_v48 = vpop.f32.mrb[28].mxu1  ;;  %v2218_v0 = vpop.eup %2217 }
 0x3cc   : > { %v1825_v20 = vpop.f32.mrb[29].mxu1 }
 0x3cd   : > { %1563 = vst [vmem:[%s3148_s12 + $0x20] sm:$0xff] %v1547_v35  ;;  %v1532_v32 = vadd.f32 %v3141_v25, %v1509_v43  ;;  %v1826_v37 = vadd.f32 %v1825_v20, %v1824_v48 }
 0x3cf   : > { %v1548_v62 = vmax.f32 %v1532_v32, 0.0  ;;  %v1510_v38 = vmul.f32 %v2204_v12, %v1826_v37  ;;  %v1827_v45 = vpop.f32.mrb[30].mxu1  ;;  %v2220_v37 = vpop.eup %2219 }
 0x3d0   : > { %v1828_v41 = vpop.f32.mrb[31].mxu1 }
 0x3d1   : > { %1564 = vst [vmem:[%s3148_s12 + $0x28] sm:$0xff] %v1548_v62  ;;  %v1533_v33 = vadd.f32 %v3141_v25, %v1510_v38  ;;  %v1829_v22 = vadd.f32 %v1828_v41, %v1827_v45 }
 0x3d3   : > { %v1549_v27 = vmax.f32 %v1533_v33, 0.0  ;;  %v1511_v2 = vmul.f32 %v2206_v47, %v1829_v22  ;;  %v1830_v5 = vpop.f32.mrb[32].mxu1  ;;  %v2222_v33 = vpop.eup %2221 }
 0x3d4   : > { %v1831_v8 = vpop.f32.mrb[33].mxu1 }
 0x3d5   : > { %1565 = vst [vmem:[%s3148_s12 + $0x30] sm:$0xff] %v1549_v27  ;;  %v1534_v53 = vadd.f32 %v3141_v25, %v1511_v2  ;;  %v1832_v34 = vadd.f32 %v1831_v8, %v1830_v5 }
 0x3d7   : > { %v1550_v7 = vmax.f32 %v1534_v53, 0.0  ;;  %v1512_v14 = vmul.f32 %v2208_v50, %v1832_v34  ;;  %v1833_v39 = vpop.f32.mrb[34].mxu1 }
 0x3d8   : > { %v1834_v4 = vpop.f32.mrb[35].mxu1 }
 0x3d9   : > { %1566 = vst [vmem:[%s3148_s12 + $0x38] sm:$0xff] %v1550_v7  ;;  %v1535_v46 = vadd.f32 %v3141_v25, %v1512_v14  ;;  %v1835_v16 = vadd.f32 %v1834_v4, %v1833_v39 }
 0x3db   : > { %v1551_v6 = vmax.f32 %v1535_v46, 0.0  ;;  %v1513_v56 = vmul.f32 %v2210_v18, %v1835_v16  ;;  %v1836_v15 = vpop.f32.mrb[36].mxu1 }
 0x3dc   : > { %v1837_v30 = vpop.f32.mrb[37].mxu1 }
 0x3dd   : > { %1567 = vst [vmem:[%s3148_s12 + $0x40] sm:$0xff] %v1551_v6  ;;  %v1536_v11 = vadd.f32 %v3141_v25, %v1513_v56  ;;  %v1838_v26 = vadd.f32 %v1837_v30, %v1836_v15 }
 0x3df   : > { %v1552_v61 = vmax.f32 %v1536_v11, 0.0  ;;  %v1514_v59 = vmul.f32 %v2212_v58, %v1838_v26  ;;  %v1839_v36 = vpop.f32.mrb[38].mxu1 }
 0x3e0   : > { %v1840_v23 = vpop.f32.mrb[39].mxu1 }
 0x3e1   : > { %1568 = vst [vmem:[%s3148_s12 + $0x48] sm:$0xff] %v1552_v61  ;;  %v1537_v9 = vadd.f32 %v3141_v25, %v1514_v59  ;;  %v1841_v17 = vadd.f32 %v1840_v23, %v1839_v36 }
 0x3e3   : > { %v1553_v24 = vmax.f32 %v1537_v9, 0.0  ;;  %v1515_v31 = vmul.f32 %v2214_v10, %v1841_v17  ;;  %v1842_v21 = vpop.f32.mrb[40].mxu1 }
 0x3e4   : > { %v1843_v55 = vpop.f32.mrb[41].mxu1 }
 0x3e5   : > { %1569 = vst [vmem:[%s3148_s12 + $0x50] sm:$0xff] %v1553_v24  ;;  %v1538_v1 = vadd.f32 %v3141_v25, %v1515_v31  ;;  %v1844_v28 = vadd.f32 %v1843_v55, %v1842_v21 }
 0x3e7   : > { %v1554_v19 = vmax.f32 %v1538_v1, 0.0  ;;  %v1516_v60 = vmul.f32 %v2216_v49, %v1844_v28  ;;  %v1845_v57 = vpop.f32.mrb[42].mxu1 }
 0x3e8   : > { %v1846_v63 = vpop.f32.mrb[43].mxu1 }
 0x3e9   : > { %1570 = vst [vmem:[%s3148_s12 + $0x58] sm:$0xff] %v1554_v19  ;;  %v1539_v3 = vadd.f32 %v3141_v25, %v1516_v60  ;;  %v1847_v40 = vadd.f32 %v1846_v63, %v1845_v57 }
 0x3eb   : > { %v1555_v35 = vmax.f32 %v1539_v3, 0.0  ;;  %v1517_v43 = vmul.f32 %v2218_v0, %v1847_v40  ;;  %v1848_v48 = vpop.f32.mrb[44].mxu1 }
 0x3ec   : > { %v1849_v20 = vpop.f32.mrb[45].mxu1 }
 0x3ed   : > { %1571 = vst [vmem:[%s3148_s12 + $0x60] sm:$0xff] %v1555_v35  ;;  %v1540_v29 = vadd.f32 %v3141_v25, %v1517_v43  ;;  %v1850_v32 = vadd.f32 %v1849_v20, %v1848_v48 }
 0x3ef   : > { %v1556_v12 = vmax.f32 %v1540_v29, 0.0  ;;  %v1518_v62 = vmul.f32 %v2220_v37, %v1850_v32  ;;  %v1851_v38 = vpop.f32.mrb[46].mxu1 }
 0x3f0   : > { %v1852_v45 = vpop.f32.mrb[47].mxu1 }
 0x3f1   : > { %1572 = vst [vmem:[%s3148_s12 + $0x68] sm:$0xff] %v1556_v12  ;;  %v1541_v41 = vadd.f32 %v3141_v25, %v1518_v62  ;;  %v1853_v13 = vadd.f32 %v1852_v45, %v1851_v38 }
 0x3f3   : > { %v1557_v22 = vmax.f32 %v1541_v41, 0.0  ;;  %v1519_v47 = vmul.f32 %v2222_v33, %v1853_v13 }
 0x3f5   : > { %1573 = vst [vmem:[%s3148_s12 + $0x70] sm:$0xff] %v1557_v22  ;;  %v1542_v27 = vadd.f32 %v3141_v25, %v1519_v47 }
 0x3f7   : > { %v1558_v2 = vmax.f32 %v1542_v27, 0.0 }
 0x3f9   : > { %1574 = vst [vmem:[%s3148_s12 + $0x78] sm:$0xff] %v1558_v2 }
 0x3fa PF: > { %s17_s24 = sadd.s32 1, %s2229_s24  }
 0x3fb   : > { %p14_p4 = scmp.ge.s32.totalorder %s17_s24, 4  }
 0x3fd   :  { %16 = sbr.rel (!%p14_p4) target bundleno = 1 (0x1), region = 81 }

</bundles_post_ra>
